<compile_context>
chip_gen: v6e
topology: v6e:2x2x1
jax: 0.10.0
libtpu: 0.0.40
codegen_flags: <defaults>
</compile_context>

<pallas_src>
import numpy as np
import jax
import jax.numpy as jnp
from jax.experimental import pallas as pl
from jax.experimental.pallas import tpu as pltpu


def _round_up(x: int, m: int) -> int:
    return (x + m - 1) // m * m


# ----------------------------------------------------------------------------
# Gaussian window (matches torchgeometry get_gaussian_kernel, sigma = 1.5)
# ----------------------------------------------------------------------------
def _gaussian_kernel1d(kernel_size: int, sigma: float = 1.5) -> np.ndarray:
    assert kernel_size % 2 == 1, "SSIM window size must be odd"
    x = np.arange(kernel_size, dtype=np.float64) - kernel_size // 2
    g = np.exp(-(x ** 2) / (2.0 * sigma ** 2))
    return (g / g.sum()).astype(np.float32)


def _gaussian_kernel2d(kernel_size: int, sigma: float = 1.5) -> np.ndarray:
    g = _gaussian_kernel1d(kernel_size, sigma)
    return np.outer(g, g).astype(np.float32)


# ----------------------------------------------------------------------------
# Pallas SSIM-loss kernel (torchgeometry tgm.losses.SSIM, reduction='none')
# ----------------------------------------------------------------------------
def _make_ssim_kernel(g1d: np.ndarray, pad: int, nb: int, C1: float, C2: float):
    """Kernel over a block of `nb` padded image pairs; emits per-pixel SSIM loss."""
    g = [float(v) for v in g1d]

    def blur(img):
        # Separable Gaussian blur via circular shifts.  The canvas has the image at
        # the origin with >= 2*pad trailing zero rows/cols, so the wrap-around of a
        # +/-off roll lands on zeros for every valid output pixel -> exact zero-pad
        # convolution on the region we keep.  Pairing the +off / -off taps exploits
        # kernel symmetry (half the multiplies) and makes the math independent of
        # the roll sign convention.
        hq, wq = img.shape
        # horizontal pass (lane axis, XLU rolls)
        acc = g[pad] * img
        for off in range(1, pad + 1):
            w = g[pad + off]
            acc = acc + w * (pltpu.roll(img, off, axis=1) +
                             pltpu.roll(img, wq - off, axis=1))
        # vertical pass (sublane axis)
        out = g[pad] * acc
        for off in range(1, pad + 1):
            w = g[pad + off]
            out = out + w * (pltpu.roll(acc, off, axis=0) +
                             pltpu.roll(acc, hq - off, axis=0))
        return out

    def kernel(src_ref, tar_ref, out_ref):
        # src_ref / tar_ref / out_ref : (nb, Hp, Wp) f32, lane/sublane dense.
        for b in range(nb):
            x = src_ref[b]
            y = tar_ref[b]

            # Moment images computed once (not per tap).
            xx = x * x
            yy = y * y
            xy = x * y

            mu1 = blur(x)
            mu2 = blur(y)
            e_xx = blur(xx)
            e_yy = blur(yy)
            e_xy = blur(xy)

            mu1_sq = mu1 * mu1
            mu2_sq = mu2 * mu2
            mu12 = mu1 * mu2
            sigma1_sq = e_xx - mu1_sq
            sigma2_sq = e_yy - mu2_sq
            sigma12 = e_xy - mu12

            num = (2.0 * mu12 + C1) * (2.0 * sigma12 + C2)
            den = (mu1_sq + mu2_sq + C1) * (sigma1_sq + sigma2_sq + C2)

            # den >= ~C1*C2 > 0 everywhere (true convolution => nonneg variance),
            # so the approximate reciprocal is safe; one Newton step restores ~f32.
            inv = pl.reciprocal(den, approx=True)
            inv = inv * (2.0 - den * inv)
            ssim_map = num * inv

            out_ref[b] = jnp.clip(1.0 - ssim_map, 0.0, 1.0) * 0.5

    return kernel


def ssim_loss_pallas(src_patch, tar_patch, kernel_size: int = 5,
                     max_val: float = 1.0):
    """tgm.losses.SSIM(window_size=kernel_size, reduction='none')(src, tar)."""
    N, C, H, W = src_patch.shape
    assert C == 1, "S3IM uses single-channel virtual patches"
    assert kernel_size % 2 == 1
    pad = (kernel_size - 1) // 2
    g1d = _gaussian_kernel1d(kernel_size, 1.5)
    C1 = (0.01 * max_val) ** 2
    C2 = (0.03 * max_val) ** 2

    # Lane/sublane-dense canvas: image at the origin, >= 2*pad trailing zeros on both
    # spatial axes; last dim rounded to a multiple of 128 so all stores are unmasked.
    Hp = _round_up(H + 2 * pad, 8)
    Wp = _round_up(W + 2 * pad, 128)

    src = src_patch.reshape(N, H, W).astype(jnp.float32)
    tar = tar_patch.reshape(N, H, W).astype(jnp.float32)
    src_p = jnp.pad(src, ((0, 0), (0, Hp - H), (0, Wp - W)))
    tar_p = jnp.pad(tar, ((0, 0), (0, Hp - H), (0, Wp - W)))

    # Batch several small images per grid step (amortize ~0.35us/step + DMA setup).
    per_image_live_bytes = Hp * Wp * 4 * 40   # rough live-set per image incl. temps
    nb = 1
    for cand in range(1, N + 1):
        if N % cand == 0 and cand * per_image_live_bytes <= (8 << 20):
            nb = cand

    # Explicit scoped-VMEM budget so the same tiling compiles on v5e/v6e/v7x.
    vmem_limit = int(min(48 << 20, max(16 << 20, nb * Hp * Wp * 4 * 64)))

    kernel = _make_ssim_kernel(g1d, pad, nb, C1, C2)

    out_p = pl.pallas_call(
        kernel,
        out_shape=jax.ShapeDtypeStruct((N, Hp, Wp), jnp.float32),
        grid=(N // nb,),
        in_specs=[
            pl.BlockSpec((nb, Hp, Wp), lambda n: (n, 0, 0)),
            pl.BlockSpec((nb, Hp, Wp), lambda n: (n, 0, 0)),
        ],
        out_specs=pl.BlockSpec((nb, Hp, Wp), lambda n: (n, 0, 0)),
        compiler_params=pltpu.CompilerParams(
            dimension_semantics=("parallel",),
            vmem_limit_bytes=vmem_limit,
        ),
    )(src_p, tar_p)

    return out_p[:, :H, :W].reshape(N, 1, H, W)


# ----------------------------------------------------------------------------
# S3IM forward (glue: stochastic shuffle + virtual patch, plain JAX)
# ----------------------------------------------------------------------------
def s3im_forward(src, tar, key, kernel_size=5, repeat_time=10,
                 patch_height=96, patch_width=96):
    """src, tar: (N, 1, H, W) with H*W == patch_height*patch_width."""
    N = src.shape[0]
    src_vec = src.reshape(N, -1)
    tar_vec = tar.reshape(N, -1)
    D = tar_vec.shape[1]

    # TODO(synk): torch.randperm permutation values differ from jax.random.permutation;
    # semantics (first block identity, rest random perms) are preserved.
    index_list = [jnp.arange(D)]
    for _ in range(1, repeat_time):
        key, sub = jax.random.split(key)
        index_list.append(jax.random.permutation(sub, D))
    res_index = jnp.concatenate(index_list)

    tar_all = tar_vec[:, res_index]
    src_all = src_vec[:, res_index]
    tar_patch = tar_all.reshape(N, 1, patch_height, patch_width * repeat_time)
    src_patch = src_all.reshape(N, 1, patch_height, patch_width * repeat_time)

    return ssim_loss_pallas(src_patch, tar_patch, kernel_size)


# ----------------------------------------------------------------------------
# Pure-JAX (XLA conv) reference for the SSIM part, for a correctness check
# ----------------------------------------------------------------------------
def ssim_loss_ref(src_patch, tar_patch, kernel_size=5, max_val=1.0):
    pad = (kernel_size - 1) // 2
    w = jnp.asarray(_gaussian_kernel2d(kernel_size, 1.5))[None, None]  # (1,1,K,K)
    C1 = (0.01 * max_val) ** 2
    C2 = (0.03 * max_val) ** 2

    def f(x):
        return jax.lax.conv_general_dilated(
            x.astype(jnp.float32), w, (1, 1), [(pad, pad), (pad, pad)],
            dimension_numbers=("NCHW", "OIHW", "NCHW"))

    mu1, mu2 = f(src_patch), f(tar_patch)
    mu1_sq, mu2_sq, mu12 = mu1 * mu1, mu2 * mu2, mu1 * mu2
    s1 = f(src_patch * src_patch) - mu1_sq
    s2 = f(tar_patch * tar_patch) - mu2_sq
    s12 = f(src_patch * tar_patch) - mu12
    ssim_map = ((2 * mu12 + C1) * (2 * s12 + C2)) / \
               ((mu1_sq + mu2_sq + C1) * (s1 + s2 + C2))
    return jnp.clip(1.0 - ssim_map, 0.0, 1.0) / 2.0


if __name__ == "__main__":
    # Small config consistent with the module: H*W == patch_height*patch_width.
    N = 2
    kernel_size = 5
    repeat_time = 2
    patch_height = 16
    patch_width = 16

    key = jax.random.PRNGKey(0)
    k_src, k_tar, k_perm = jax.random.split(key, 3)
    src = jax.random.uniform(k_src, (N, 1, patch_height, patch_width), jnp.float32)
    tar = jax.random.uniform(k_tar, (N, 1, patch_height, patch_width), jnp.float32)

    loss = s3im_forward(src, tar, k_perm, kernel_size=kernel_size,
                        repeat_time=repeat_time, patch_height=patch_height,
                        patch_width=patch_width)
    loss = jax.block_until_ready(loss)
    assert loss.shape == (N, 1, patch_height, patch_width * repeat_time)

    # Cross-check the Pallas SSIM against the XLA-conv reference on the same patches.
    src_vec = src.reshape(N, -1)
    tar_vec = tar.reshape(N, -1)
    D = src_vec.shape[1]
    idx_list = [jnp.arange(D)]
    kk = k_perm
    for _ in range(1, repeat_time):
        kk, sub = jax.random.split(kk)
        idx_list.append(jax.random.permutation(sub, D))
    res_index = jnp.concatenate(idx_list)
    src_patch = src_vec[:, res_index].reshape(N, 1, patch_height, patch_width * repeat_time)
    tar_patch = tar_vec[:, res_index].reshape(N, 1, patch_height, patch_width * repeat_time)
    ref = jax.block_until_ready(ssim_loss_ref(src_patch, tar_patch, kernel_size))
    np.testing.assert_allclose(np.asarray(loss), np.asarray(ref), atol=1e-5, rtol=1e-5)

    print("KERNEL_OK")
</pallas_src>

<mosaic_0001>
module attributes {stable_mosaic.version = 11 : i64} {
  func.func @kernel(%arg0: i32, %arg1: memref<2x24x128xf32, #tpu.memory_space<vmem>>, %arg2: memref<2x24x128xf32, #tpu.memory_space<vmem>>, %arg3: memref<2x24x128xf32, #tpu.memory_space<vmem>>) attributes {dimension_semantics = [#tpu.dimension_semantics<parallel>], iteration_bounds = array<i64: 1>, scalar_prefetch = 0 : i64, scratch_operands = 0 : i64, tpu.core_type = #tpu.core_type<tc>, window_params = [{transform_indices = @transform_0, window_bounds = array<i64: 2, 24, 128>}, {transform_indices = @transform_1, window_bounds = array<i64: 2, 24, 128>}, {transform_indices = @transform_2, window_bounds = array<i64: 2, 24, 128>}]} {
    %c0 = arith.constant 0 : index
    %c0_0 = arith.constant 0 : index
    %c0_1 = arith.constant 0 : index
    %0 = vector.load %arg1[%c0, %c0_0, %c0_1] : memref<2x24x128xf32, #tpu.memory_space<vmem>>, vector<1x24x128xf32>
    %1 = vector.shape_cast %0 : vector<1x24x128xf32> to vector<24x128xf32>
    %c0_2 = arith.constant 0 : index
    %c0_3 = arith.constant 0 : index
    %c0_4 = arith.constant 0 : index
    %2 = vector.load %arg2[%c0_2, %c0_3, %c0_4] : memref<2x24x128xf32, #tpu.memory_space<vmem>>, vector<1x24x128xf32>
    %3 = vector.shape_cast %2 : vector<1x24x128xf32> to vector<24x128xf32>
    %4 = arith.mulf %1, %1 : vector<24x128xf32>
    %5 = arith.mulf %3, %3 : vector<24x128xf32>
    %6 = arith.mulf %1, %3 : vector<24x128xf32>
    %cst = arith.constant 0.292081714 : f32
    %7 = vector.broadcast %cst : f32 to vector<24x128xf32>
    %8 = arith.mulf %7, %1 : vector<24x128xf32>
    %c1_i32 = arith.constant 1 : i32
    %9 = tpu.dynamic_rotate %1 by %c1_i32 dim 1 : vector<24x128xf32>, i32 -> vector<24x128xf32>
    %c127_i32 = arith.constant 127 : i32
    %10 = tpu.dynamic_rotate %1 by %c127_i32 dim 1 : vector<24x128xf32>, i32 -> vector<24x128xf32>
    %11 = arith.addf %9, %10 : vector<24x128xf32>
    %cst_5 = arith.constant 0.233880758 : f32
    %12 = vector.broadcast %cst_5 : f32 to vector<24x128xf32>
    %13 = arith.mulf %12, %11 : vector<24x128xf32>
    %14 = arith.addf %8, %13 : vector<24x128xf32>
    %c2_i32 = arith.constant 2 : i32
    %15 = tpu.dynamic_rotate %1 by %c2_i32 dim 1 : vector<24x128xf32>, i32 -> vector<24x128xf32>
    %c126_i32 = arith.constant 126 : i32
    %16 = tpu.dynamic_rotate %1 by %c126_i32 dim 1 : vector<24x128xf32>, i32 -> vector<24x128xf32>
    %17 = arith.addf %15, %16 : vector<24x128xf32>
    %cst_6 = arith.constant 0.120078385 : f32
    %18 = vector.broadcast %cst_6 : f32 to vector<24x128xf32>
    %19 = arith.mulf %18, %17 : vector<24x128xf32>
    %20 = arith.addf %14, %19 : vector<24x128xf32>
    %cst_7 = arith.constant 0.292081714 : f32
    %21 = vector.broadcast %cst_7 : f32 to vector<24x128xf32>
    %22 = arith.mulf %21, %20 : vector<24x128xf32>
    %c1_i32_8 = arith.constant 1 : i32
    %23 = tpu.dynamic_rotate %20 by %c1_i32_8 dim 0 : vector<24x128xf32>, i32 -> vector<24x128xf32>
    %c23_i32 = arith.constant 23 : i32
    %24 = tpu.dynamic_rotate %20 by %c23_i32 dim 0 : vector<24x128xf32>, i32 -> vector<24x128xf32>
    %25 = arith.addf %23, %24 : vector<24x128xf32>
    %cst_9 = arith.constant 0.233880758 : f32
    %26 = vector.broadcast %cst_9 : f32 to vector<24x128xf32>
    %27 = arith.mulf %26, %25 : vector<24x128xf32>
    %28 = arith.addf %22, %27 : vector<24x128xf32>
    %c2_i32_10 = arith.constant 2 : i32
    %29 = tpu.dynamic_rotate %20 by %c2_i32_10 dim 0 : vector<24x128xf32>, i32 -> vector<24x128xf32>
    %c22_i32 = arith.constant 22 : i32
    %30 = tpu.dynamic_rotate %20 by %c22_i32 dim 0 : vector<24x128xf32>, i32 -> vector<24x128xf32>
    %31 = arith.addf %29, %30 : vector<24x128xf32>
    %cst_11 = arith.constant 0.120078385 : f32
    %32 = vector.broadcast %cst_11 : f32 to vector<24x128xf32>
    %33 = arith.mulf %32, %31 : vector<24x128xf32>
    %34 = arith.addf %28, %33 : vector<24x128xf32>
    %cst_12 = arith.constant 0.292081714 : f32
    %35 = vector.broadcast %cst_12 : f32 to vector<24x128xf32>
    %36 = arith.mulf %35, %3 : vector<24x128xf32>
    %c1_i32_13 = arith.constant 1 : i32
    %37 = tpu.dynamic_rotate %3 by %c1_i32_13 dim 1 : vector<24x128xf32>, i32 -> vector<24x128xf32>
    %c127_i32_14 = arith.constant 127 : i32
    %38 = tpu.dynamic_rotate %3 by %c127_i32_14 dim 1 : vector<24x128xf32>, i32 -> vector<24x128xf32>
    %39 = arith.addf %37, %38 : vector<24x128xf32>
    %cst_15 = arith.constant 0.233880758 : f32
    %40 = vector.broadcast %cst_15 : f32 to vector<24x128xf32>
    %41 = arith.mulf %40, %39 : vector<24x128xf32>
    %42 = arith.addf %36, %41 : vector<24x128xf32>
    %c2_i32_16 = arith.constant 2 : i32
    %43 = tpu.dynamic_rotate %3 by %c2_i32_16 dim 1 : vector<24x128xf32>, i32 -> vector<24x128xf32>
    %c126_i32_17 = arith.constant 126 : i32
    %44 = tpu.dynamic_rotate %3 by %c126_i32_17 dim 1 : vector<24x128xf32>, i32 -> vector<24x128xf32>
    %45 = arith.addf %43, %44 : vector<24x128xf32>
    %cst_18 = arith.constant 0.120078385 : f32
    %46 = vector.broadcast %cst_18 : f32 to vector<24x128xf32>
    %47 = arith.mulf %46, %45 : vector<24x128xf32>
    %48 = arith.addf %42, %47 : vector<24x128xf32>
    %cst_19 = arith.constant 0.292081714 : f32
    %49 = vector.broadcast %cst_19 : f32 to vector<24x128xf32>
    %50 = arith.mulf %49, %48 : vector<24x128xf32>
    %c1_i32_20 = arith.constant 1 : i32
    %51 = tpu.dynamic_rotate %48 by %c1_i32_20 dim 0 : vector<24x128xf32>, i32 -> vector<24x128xf32>
    %c23_i32_21 = arith.constant 23 : i32
    %52 = tpu.dynamic_rotate %48 by %c23_i32_21 dim 0 : vector<24x128xf32>, i32 -> vector<24x128xf32>
    %53 = arith.addf %51, %52 : vector<24x128xf32>
    %cst_22 = arith.constant 0.233880758 : f32
    %54 = vector.broadcast %cst_22 : f32 to vector<24x128xf32>
    %55 = arith.mulf %54, %53 : vector<24x128xf32>
    %56 = arith.addf %50, %55 : vector<24x128xf32>
    %c2_i32_23 = arith.constant 2 : i32
    %57 = tpu.dynamic_rotate %48 by %c2_i32_23 dim 0 : vector<24x128xf32>, i32 -> vector<24x128xf32>
    %c22_i32_24 = arith.constant 22 : i32
    %58 = tpu.dynamic_rotate %48 by %c22_i32_24 dim 0 : vector<24x128xf32>, i32 -> vector<24x128xf32>
    %59 = arith.addf %57, %58 : vector<24x128xf32>
    %cst_25 = arith.constant 0.120078385 : f32
    %60 = vector.broadcast %cst_25 : f32 to vector<24x128xf32>
    %61 = arith.mulf %60, %59 : vector<24x128xf32>
    %62 = arith.addf %56, %61 : vector<24x128xf32>
    %cst_26 = arith.constant 0.292081714 : f32
    %63 = vector.broadcast %cst_26 : f32 to vector<24x128xf32>
    %64 = arith.mulf %63, %4 : vector<24x128xf32>
    %c1_i32_27 = arith.constant 1 : i32
    %65 = tpu.dynamic_rotate %4 by %c1_i32_27 dim 1 : vector<24x128xf32>, i32 -> vector<24x128xf32>
    %c127_i32_28 = arith.constant 127 : i32
    %66 = tpu.dynamic_rotate %4 by %c127_i32_28 dim 1 : vector<24x128xf32>, i32 -> vector<24x128xf32>
    %67 = arith.addf %65, %66 : vector<24x128xf32>
    %cst_29 = arith.constant 0.233880758 : f32
    %68 = vector.broadcast %cst_29 : f32 to vector<24x128xf32>
    %69 = arith.mulf %68, %67 : vector<24x128xf32>
    %70 = arith.addf %64, %69 : vector<24x128xf32>
    %c2_i32_30 = arith.constant 2 : i32
    %71 = tpu.dynamic_rotate %4 by %c2_i32_30 dim 1 : vector<24x128xf32>, i32 -> vector<24x128xf32>
    %c126_i32_31 = arith.constant 126 : i32
    %72 = tpu.dynamic_rotate %4 by %c126_i32_31 dim 1 : vector<24x128xf32>, i32 -> vector<24x128xf32>
    %73 = arith.addf %71, %72 : vector<24x128xf32>
    %cst_32 = arith.constant 0.120078385 : f32
    %74 = vector.broadcast %cst_32 : f32 to vector<24x128xf32>
    %75 = arith.mulf %74, %73 : vector<24x128xf32>
    %76 = arith.addf %70, %75 : vector<24x128xf32>
    %cst_33 = arith.constant 0.292081714 : f32
    %77 = vector.broadcast %cst_33 : f32 to vector<24x128xf32>
    %78 = arith.mulf %77, %76 : vector<24x128xf32>
    %c1_i32_34 = arith.constant 1 : i32
    %79 = tpu.dynamic_rotate %76 by %c1_i32_34 dim 0 : vector<24x128xf32>, i32 -> vector<24x128xf32>
    %c23_i32_35 = arith.constant 23 : i32
    %80 = tpu.dynamic_rotate %76 by %c23_i32_35 dim 0 : vector<24x128xf32>, i32 -> vector<24x128xf32>
    %81 = arith.addf %79, %80 : vector<24x128xf32>
    %cst_36 = arith.constant 0.233880758 : f32
    %82 = vector.broadcast %cst_36 : f32 to vector<24x128xf32>
    %83 = arith.mulf %82, %81 : vector<24x128xf32>
    %84 = arith.addf %78, %83 : vector<24x128xf32>
    %c2_i32_37 = arith.constant 2 : i32
    %85 = tpu.dynamic_rotate %76 by %c2_i32_37 dim 0 : vector<24x128xf32>, i32 -> vector<24x128xf32>
    %c22_i32_38 = arith.constant 22 : i32
    %86 = tpu.dynamic_rotate %76 by %c22_i32_38 dim 0 : vector<24x128xf32>, i32 -> vector<24x128xf32>
    %87 = arith.addf %85, %86 : vector<24x128xf32>
    %cst_39 = arith.constant 0.120078385 : f32
    %88 = vector.broadcast %cst_39 : f32 to vector<24x128xf32>
    %89 = arith.mulf %88, %87 : vector<24x128xf32>
    %90 = arith.addf %84, %89 : vector<24x128xf32>
    %cst_40 = arith.constant 0.292081714 : f32
    %91 = vector.broadcast %cst_40 : f32 to vector<24x128xf32>
    %92 = arith.mulf %91, %5 : vector<24x128xf32>
    %c1_i32_41 = arith.constant 1 : i32
    %93 = tpu.dynamic_rotate %5 by %c1_i32_41 dim 1 : vector<24x128xf32>, i32 -> vector<24x128xf32>
    %c127_i32_42 = arith.constant 127 : i32
    %94 = tpu.dynamic_rotate %5 by %c127_i32_42 dim 1 : vector<24x128xf32>, i32 -> vector<24x128xf32>
    %95 = arith.addf %93, %94 : vector<24x128xf32>
    %cst_43 = arith.constant 0.233880758 : f32
    %96 = vector.broadcast %cst_43 : f32 to vector<24x128xf32>
    %97 = arith.mulf %96, %95 : vector<24x128xf32>
    %98 = arith.addf %92, %97 : vector<24x128xf32>
    %c2_i32_44 = arith.constant 2 : i32
    %99 = tpu.dynamic_rotate %5 by %c2_i32_44 dim 1 : vector<24x128xf32>, i32 -> vector<24x128xf32>
    %c126_i32_45 = arith.constant 126 : i32
    %100 = tpu.dynamic_rotate %5 by %c126_i32_45 dim 1 : vector<24x128xf32>, i32 -> vector<24x128xf32>
    %101 = arith.addf %99, %100 : vector<24x128xf32>
    %cst_46 = arith.constant 0.120078385 : f32
    %102 = vector.broadcast %cst_46 : f32 to vector<24x128xf32>
    %103 = arith.mulf %102, %101 : vector<24x128xf32>
    %104 = arith.addf %98, %103 : vector<24x128xf32>
    %cst_47 = arith.constant 0.292081714 : f32
    %105 = vector.broadcast %cst_47 : f32 to vector<24x128xf32>
    %106 = arith.mulf %105, %104 : vector<24x128xf32>
    %c1_i32_48 = arith.constant 1 : i32
    %107 = tpu.dynamic_rotate %104 by %c1_i32_48 dim 0 : vector<24x128xf32>, i32 -> vector<24x128xf32>
    %c23_i32_49 = arith.constant 23 : i32
    %108 = tpu.dynamic_rotate %104 by %c23_i32_49 dim 0 : vector<24x128xf32>, i32 -> vector<24x128xf32>
    %109 = arith.addf %107, %108 : vector<24x128xf32>
    %cst_50 = arith.constant 0.233880758 : f32
    %110 = vector.broadcast %cst_50 : f32 to vector<24x128xf32>
    %111 = arith.mulf %110, %109 : vector<24x128xf32>
    %112 = arith.addf %106, %111 : vector<24x128xf32>
    %c2_i32_51 = arith.constant 2 : i32
    %113 = tpu.dynamic_rotate %104 by %c2_i32_51 dim 0 : vector<24x128xf32>, i32 -> vector<24x128xf32>
    %c22_i32_52 = arith.constant 22 : i32
    %114 = tpu.dynamic_rotate %104 by %c22_i32_52 dim 0 : vector<24x128xf32>, i32 -> vector<24x128xf32>
    %115 = arith.addf %113, %114 : vector<24x128xf32>
    %cst_53 = arith.constant 0.120078385 : f32
    %116 = vector.broadcast %cst_53 : f32 to vector<24x128xf32>
    %117 = arith.mulf %116, %115 : vector<24x128xf32>
    %118 = arith.addf %112, %117 : vector<24x128xf32>
    %cst_54 = arith.constant 0.292081714 : f32
    %119 = vector.broadcast %cst_54 : f32 to vector<24x128xf32>
    %120 = arith.mulf %119, %6 : vector<24x128xf32>
    %c1_i32_55 = arith.constant 1 : i32
    %121 = tpu.dynamic_rotate %6 by %c1_i32_55 dim 1 : vector<24x128xf32>, i32 -> vector<24x128xf32>
    %c127_i32_56 = arith.constant 127 : i32
    %122 = tpu.dynamic_rotate %6 by %c127_i32_56 dim 1 : vector<24x128xf32>, i32 -> vector<24x128xf32>
    %123 = arith.addf %121, %122 : vector<24x128xf32>
    %cst_57 = arith.constant 0.233880758 : f32
    %124 = vector.broadcast %cst_57 : f32 to vector<24x128xf32>
    %125 = arith.mulf %124, %123 : vector<24x128xf32>
    %126 = arith.addf %120, %125 : vector<24x128xf32>
    %c2_i32_58 = arith.constant 2 : i32
    %127 = tpu.dynamic_rotate %6 by %c2_i32_58 dim 1 : vector<24x128xf32>, i32 -> vector<24x128xf32>
    %c126_i32_59 = arith.constant 126 : i32
    %128 = tpu.dynamic_rotate %6 by %c126_i32_59 dim 1 : vector<24x128xf32>, i32 -> vector<24x128xf32>
    %129 = arith.addf %127, %128 : vector<24x128xf32>
    %cst_60 = arith.constant 0.120078385 : f32
    %130 = vector.broadcast %cst_60 : f32 to vector<24x128xf32>
    %131 = arith.mulf %130, %129 : vector<24x128xf32>
    %132 = arith.addf %126, %131 : vector<24x128xf32>
    %cst_61 = arith.constant 0.292081714 : f32
    %133 = vector.broadcast %cst_61 : f32 to vector<24x128xf32>
    %134 = arith.mulf %133, %132 : vector<24x128xf32>
    %c1_i32_62 = arith.constant 1 : i32
    %135 = tpu.dynamic_rotate %132 by %c1_i32_62 dim 0 : vector<24x128xf32>, i32 -> vector<24x128xf32>
    %c23_i32_63 = arith.constant 23 : i32
    %136 = tpu.dynamic_rotate %132 by %c23_i32_63 dim 0 : vector<24x128xf32>, i32 -> vector<24x128xf32>
    %137 = arith.addf %135, %136 : vector<24x128xf32>
    %cst_64 = arith.constant 0.233880758 : f32
    %138 = vector.broadcast %cst_64 : f32 to vector<24x128xf32>
    %139 = arith.mulf %138, %137 : vector<24x128xf32>
    %140 = arith.addf %134, %139 : vector<24x128xf32>
    %c2_i32_65 = arith.constant 2 : i32
    %141 = tpu.dynamic_rotate %132 by %c2_i32_65 dim 0 : vector<24x128xf32>, i32 -> vector<24x128xf32>
    %c22_i32_66 = arith.constant 22 : i32
    %142 = tpu.dynamic_rotate %132 by %c22_i32_66 dim 0 : vector<24x128xf32>, i32 -> vector<24x128xf32>
    %143 = arith.addf %141, %142 : vector<24x128xf32>
    %cst_67 = arith.constant 0.120078385 : f32
    %144 = vector.broadcast %cst_67 : f32 to vector<24x128xf32>
    %145 = arith.mulf %144, %143 : vector<24x128xf32>
    %146 = arith.addf %140, %145 : vector<24x128xf32>
    %147 = arith.mulf %34, %34 : vector<24x128xf32>
    %148 = arith.mulf %62, %62 : vector<24x128xf32>
    %149 = arith.mulf %34, %62 : vector<24x128xf32>
    %150 = arith.subf %90, %147 : vector<24x128xf32>
    %151 = arith.subf %118, %148 : vector<24x128xf32>
    %152 = arith.subf %146, %149 : vector<24x128xf32>
    %cst_68 = arith.constant 2.000000e+00 : f32
    %153 = vector.broadcast %cst_68 : f32 to vector<24x128xf32>
    %154 = arith.mulf %153, %149 : vector<24x128xf32>
    %cst_69 = arith.constant 9.99999974E-5 : f32
    %155 = vector.broadcast %cst_69 : f32 to vector<24x128xf32>
    %156 = arith.addf %154, %155 : vector<24x128xf32>
    %cst_70 = arith.constant 2.000000e+00 : f32
    %157 = vector.broadcast %cst_70 : f32 to vector<24x128xf32>
    %158 = arith.mulf %157, %152 : vector<24x128xf32>
    %cst_71 = arith.constant 8.99999984E-4 : f32
    %159 = vector.broadcast %cst_71 : f32 to vector<24x128xf32>
    %160 = arith.addf %158, %159 : vector<24x128xf32>
    %161 = arith.mulf %156, %160 : vector<24x128xf32>
    %162 = arith.addf %147, %148 : vector<24x128xf32>
    %cst_72 = arith.constant 9.99999974E-5 : f32
    %163 = vector.broadcast %cst_72 : f32 to vector<24x128xf32>
    %164 = arith.addf %162, %163 : vector<24x128xf32>
    %165 = arith.addf %150, %151 : vector<24x128xf32>
    %cst_73 = arith.constant 8.99999984E-4 : f32
    %166 = vector.broadcast %cst_73 : f32 to vector<24x128xf32>
    %167 = arith.addf %165, %166 : vector<24x128xf32>
    %168 = arith.mulf %164, %167 : vector<24x128xf32>
    %169 = tpu.reciprocal %168 {approx = true} : vector<24x128xf32> -> vector<24x128xf32>
    %170 = arith.mulf %168, %169 : vector<24x128xf32>
    %cst_74 = arith.constant 2.000000e+00 : f32
    %171 = vector.broadcast %cst_74 : f32 to vector<24x128xf32>
    %172 = arith.subf %171, %170 : vector<24x128xf32>
    %173 = arith.mulf %169, %172 : vector<24x128xf32>
    %174 = arith.mulf %161, %173 : vector<24x128xf32>
    %cst_75 = arith.constant 1.000000e+00 : f32
    %175 = vector.broadcast %cst_75 : f32 to vector<24x128xf32>
    %176 = arith.subf %175, %174 : vector<24x128xf32>
    %cst_76 = arith.constant 0.000000e+00 : f32
    %cst_77 = arith.constant 1.000000e+00 : f32
    %177 = vector.broadcast %cst_76 : f32 to vector<24x128xf32>
    %178 = arith.maximumf %177, %176 : vector<24x128xf32>
    %179 = vector.broadcast %cst_77 : f32 to vector<24x128xf32>
    %180 = arith.minimumf %179, %178 : vector<24x128xf32>
    %cst_78 = arith.constant 5.000000e-01 : f32
    %181 = vector.broadcast %cst_78 : f32 to vector<24x128xf32>
    %182 = arith.mulf %180, %181 : vector<24x128xf32>
    %c0_79 = arith.constant 0 : index
    %c0_80 = arith.constant 0 : index
    %c0_81 = arith.constant 0 : index
    %183 = vector.load %arg3[%c0_79, %c0_80, %c0_81] : memref<2x24x128xf32, #tpu.memory_space<vmem>>, vector<1x24x128xf32>
    %184 = vector.shape_cast %183 : vector<1x24x128xf32> to vector<24x128xf32>
    %185 = vector.shape_cast %182 : vector<24x128xf32> to vector<1x24x128xf32>
    tpu.vector_store %arg3[%c0_79, %c0_80, %c0_81], %185 {strides = array<i32>} : memref<2x24x128xf32, #tpu.memory_space<vmem>>, vector<1x24x128xf32>,
    %c1 = arith.constant 1 : index
    %c0_82 = arith.constant 0 : index
    %c0_83 = arith.constant 0 : index
    %186 = vector.load %arg1[%c1, %c0_82, %c0_83] : memref<2x24x128xf32, #tpu.memory_space<vmem>>, vector<1x24x128xf32>
    %187 = vector.shape_cast %186 : vector<1x24x128xf32> to vector<24x128xf32>
    %c1_84 = arith.constant 1 : index
    %c0_85 = arith.constant 0 : index
    %c0_86 = arith.constant 0 : index
    %188 = vector.load %arg2[%c1_84, %c0_85, %c0_86] : memref<2x24x128xf32, #tpu.memory_space<vmem>>, vector<1x24x128xf32>
    %189 = vector.shape_cast %188 : vector<1x24x128xf32> to vector<24x128xf32>
    %190 = arith.mulf %187, %187 : vector<24x128xf32>
    %191 = arith.mulf %189, %189 : vector<24x128xf32>
    %192 = arith.mulf %187, %189 : vector<24x128xf32>
    %cst_87 = arith.constant 0.292081714 : f32
    %193 = vector.broadcast %cst_87 : f32 to vector<24x128xf32>
    %194 = arith.mulf %193, %187 : vector<24x128xf32>
    %c1_i32_88 = arith.constant 1 : i32
    %195 = tpu.dynamic_rotate %187 by %c1_i32_88 dim 1 : vector<24x128xf32>, i32 -> vector<24x128xf32>
    %c127_i32_89 = arith.constant 127 : i32
    %196 = tpu.dynamic_rotate %187 by %c127_i32_89 dim 1 : vector<24x128xf32>, i32 -> vector<24x128xf32>
    %197 = arith.addf %195, %196 : vector<24x128xf32>
    %cst_90 = arith.constant 0.233880758 : f32
    %198 = vector.broadcast %cst_90 : f32 to vector<24x128xf32>
    %199 = arith.mulf %198, %197 : vector<24x128xf32>
    %200 = arith.addf %194, %199 : vector<24x128xf32>
    %c2_i32_91 = arith.constant 2 : i32
    %201 = tpu.dynamic_rotate %187 by %c2_i32_91 dim 1 : vector<24x128xf32>, i32 -> vector<24x128xf32>
    %c126_i32_92 = arith.constant 126 : i32
    %202 = tpu.dynamic_rotate %187 by %c126_i32_92 dim 1 : vector<24x128xf32>, i32 -> vector<24x128xf32>
    %203 = arith.addf %201, %202 : vector<24x128xf32>
    %cst_93 = arith.constant 0.120078385 : f32
    %204 = vector.broadcast %cst_93 : f32 to vector<24x128xf32>
    %205 = arith.mulf %204, %203 : vector<24x128xf32>
    %206 = arith.addf %200, %205 : vector<24x128xf32>
    %cst_94 = arith.constant 0.292081714 : f32
    %207 = vector.broadcast %cst_94 : f32 to vector<24x128xf32>
    %208 = arith.mulf %207, %206 : vector<24x128xf32>
    %c1_i32_95 = arith.constant 1 : i32
    %209 = tpu.dynamic_rotate %206 by %c1_i32_95 dim 0 : vector<24x128xf32>, i32 -> vector<24x128xf32>
    %c23_i32_96 = arith.constant 23 : i32
    %210 = tpu.dynamic_rotate %206 by %c23_i32_96 dim 0 : vector<24x128xf32>, i32 -> vector<24x128xf32>
    %211 = arith.addf %209, %210 : vector<24x128xf32>
    %cst_97 = arith.constant 0.233880758 : f32
    %212 = vector.broadcast %cst_97 : f32 to vector<24x128xf32>
    %213 = arith.mulf %212, %211 : vector<24x128xf32>
    %214 = arith.addf %208, %213 : vector<24x128xf32>
    %c2_i32_98 = arith.constant 2 : i32
    %215 = tpu.dynamic_rotate %206 by %c2_i32_98 dim 0 : vector<24x128xf32>, i32 -> vector<24x128xf32>
    %c22_i32_99 = arith.constant 22 : i32
    %216 = tpu.dynamic_rotate %206 by %c22_i32_99 dim 0 : vector<24x128xf32>, i32 -> vector<24x128xf32>
    %217 = arith.addf %215, %216 : vector<24x128xf32>
    %cst_100 = arith.constant 0.120078385 : f32
    %218 = vector.broadcast %cst_100 : f32 to vector<24x128xf32>
    %219 = arith.mulf %218, %217 : vector<24x128xf32>
    %220 = arith.addf %214, %219 : vector<24x128xf32>
    %cst_101 = arith.constant 0.292081714 : f32
    %221 = vector.broadcast %cst_101 : f32 to vector<24x128xf32>
    %222 = arith.mulf %221, %189 : vector<24x128xf32>
    %c1_i32_102 = arith.constant 1 : i32
    %223 = tpu.dynamic_rotate %189 by %c1_i32_102 dim 1 : vector<24x128xf32>, i32 -> vector<24x128xf32>
    %c127_i32_103 = arith.constant 127 : i32
    %224 = tpu.dynamic_rotate %189 by %c127_i32_103 dim 1 : vector<24x128xf32>, i32 -> vector<24x128xf32>
    %225 = arith.addf %223, %224 : vector<24x128xf32>
    %cst_104 = arith.constant 0.233880758 : f32
    %226 = vector.broadcast %cst_104 : f32 to vector<24x128xf32>
    %227 = arith.mulf %226, %225 : vector<24x128xf32>
    %228 = arith.addf %222, %227 : vector<24x128xf32>
    %c2_i32_105 = arith.constant 2 : i32
    %229 = tpu.dynamic_rotate %189 by %c2_i32_105 dim 1 : vector<24x128xf32>, i32 -> vector<24x128xf32>
    %c126_i32_106 = arith.constant 126 : i32
    %230 = tpu.dynamic_rotate %189 by %c126_i32_106 dim 1 : vector<24x128xf32>, i32 -> vector<24x128xf32>
    %231 = arith.addf %229, %230 : vector<24x128xf32>
    %cst_107 = arith.constant 0.120078385 : f32
    %232 = vector.broadcast %cst_107 : f32 to vector<24x128xf32>
    %233 = arith.mulf %232, %231 : vector<24x128xf32>
    %234 = arith.addf %228, %233 : vector<24x128xf32>
    %cst_108 = arith.constant 0.292081714 : f32
    %235 = vector.broadcast %cst_108 : f32 to vector<24x128xf32>
    %236 = arith.mulf %235, %234 : vector<24x128xf32>
    %c1_i32_109 = arith.constant 1 : i32
    %237 = tpu.dynamic_rotate %234 by %c1_i32_109 dim 0 : vector<24x128xf32>, i32 -> vector<24x128xf32>
    %c23_i32_110 = arith.constant 23 : i32
    %238 = tpu.dynamic_rotate %234 by %c23_i32_110 dim 0 : vector<24x128xf32>, i32 -> vector<24x128xf32>
    %239 = arith.addf %237, %238 : vector<24x128xf32>
    %cst_111 = arith.constant 0.233880758 : f32
    %240 = vector.broadcast %cst_111 : f32 to vector<24x128xf32>
    %241 = arith.mulf %240, %239 : vector<24x128xf32>
    %242 = arith.addf %236, %241 : vector<24x128xf32>
    %c2_i32_112 = arith.constant 2 : i32
    %243 = tpu.dynamic_rotate %234 by %c2_i32_112 dim 0 : vector<24x128xf32>, i32 -> vector<24x128xf32>
    %c22_i32_113 = arith.constant 22 : i32
    %244 = tpu.dynamic_rotate %234 by %c22_i32_113 dim 0 : vector<24x128xf32>, i32 -> vector<24x128xf32>
    %245 = arith.addf %243, %244 : vector<24x128xf32>
    %cst_114 = arith.constant 0.120078385 : f32
    %246 = vector.broadcast %cst_114 : f32 to vector<24x128xf32>
    %247 = arith.mulf %246, %245 : vector<24x128xf32>
    %248 = arith.addf %242, %247 : vector<24x128xf32>
    %cst_115 = arith.constant 0.292081714 : f32
    %249 = vector.broadcast %cst_115 : f32 to vector<24x128xf32>
    %250 = arith.mulf %249, %190 : vector<24x128xf32>
    %c1_i32_116 = arith.constant 1 : i32
    %251 = tpu.dynamic_rotate %190 by %c1_i32_116 dim 1 : vector<24x128xf32>, i32 -> vector<24x128xf32>
    %c127_i32_117 = arith.constant 127 : i32
    %252 = tpu.dynamic_rotate %190 by %c127_i32_117 dim 1 : vector<24x128xf32>, i32 -> vector<24x128xf32>
    %253 = arith.addf %251, %252 : vector<24x128xf32>
    %cst_118 = arith.constant 0.233880758 : f32
    %254 = vector.broadcast %cst_118 : f32 to vector<24x128xf32>
    %255 = arith.mulf %254, %253 : vector<24x128xf32>
    %256 = arith.addf %250, %255 : vector<24x128xf32>
    %c2_i32_119 = arith.constant 2 : i32
    %257 = tpu.dynamic_rotate %190 by %c2_i32_119 dim 1 : vector<24x128xf32>, i32 -> vector<24x128xf32>
    %c126_i32_120 = arith.constant 126 : i32
    %258 = tpu.dynamic_rotate %190 by %c126_i32_120 dim 1 : vector<24x128xf32>, i32 -> vector<24x128xf32>
    %259 = arith.addf %257, %258 : vector<24x128xf32>
    %cst_121 = arith.constant 0.120078385 : f32
    %260 = vector.broadcast %cst_121 : f32 to vector<24x128xf32>
    %261 = arith.mulf %260, %259 : vector<24x128xf32>
    %262 = arith.addf %256, %261 : vector<24x128xf32>
    %cst_122 = arith.constant 0.292081714 : f32
    %263 = vector.broadcast %cst_122 : f32 to vector<24x128xf32>
    %264 = arith.mulf %263, %262 : vector<24x128xf32>
    %c1_i32_123 = arith.constant 1 : i32
    %265 = tpu.dynamic_rotate %262 by %c1_i32_123 dim 0 : vector<24x128xf32>, i32 -> vector<24x128xf32>
    %c23_i32_124 = arith.constant 23 : i32
    %266 = tpu.dynamic_rotate %262 by %c23_i32_124 dim 0 : vector<24x128xf32>, i32 -> vector<24x128xf32>
    %267 = arith.addf %265, %266 : vector<24x128xf32>
    %cst_125 = arith.constant 0.233880758 : f32
    %268 = vector.broadcast %cst_125 : f32 to vector<24x128xf32>
    %269 = arith.mulf %268, %267 : vector<24x128xf32>
    %270 = arith.addf %264, %269 : vector<24x128xf32>
    %c2_i32_126 = arith.constant 2 : i32
    %271 = tpu.dynamic_rotate %262 by %c2_i32_126 dim 0 : vector<24x128xf32>, i32 -> vector<24x128xf32>
    %c22_i32_127 = arith.constant 22 : i32
    %272 = tpu.dynamic_rotate %262 by %c22_i32_127 dim 0 : vector<24x128xf32>, i32 -> vector<24x128xf32>
    %273 = arith.addf %271, %272 : vector<24x128xf32>
    %cst_128 = arith.constant 0.120078385 : f32
    %274 = vector.broadcast %cst_128 : f32 to vector<24x128xf32>
    %275 = arith.mulf %274, %273 : vector<24x128xf32>
    %276 = arith.addf %270, %275 : vector<24x128xf32>
    %cst_129 = arith.constant 0.292081714 : f32
    %277 = vector.broadcast %cst_129 : f32 to vector<24x128xf32>
    %278 = arith.mulf %277, %191 : vector<24x128xf32>
    %c1_i32_130 = arith.constant 1 : i32
    %279 = tpu.dynamic_rotate %191 by %c1_i32_130 dim 1 : vector<24x128xf32>, i32 -> vector<24x128xf32>
    %c127_i32_131 = arith.constant 127 : i32
    %280 = tpu.dynamic_rotate %191 by %c127_i32_131 dim 1 : vector<24x128xf32>, i32 -> vector<24x128xf32>
    %281 = arith.addf %279, %280 : vector<24x128xf32>
    %cst_132 = arith.constant 0.233880758 : f32
    %282 = vector.broadcast %cst_132 : f32 to vector<24x128xf32>
    %283 = arith.mulf %282, %281 : vector<24x128xf32>
    %284 = arith.addf %278, %283 : vector<24x128xf32>
    %c2_i32_133 = arith.constant 2 : i32
    %285 = tpu.dynamic_rotate %191 by %c2_i32_133 dim 1 : vector<24x128xf32>, i32 -> vector<24x128xf32>
    %c126_i32_134 = arith.constant 126 : i32
    %286 = tpu.dynamic_rotate %191 by %c126_i32_134 dim 1 : vector<24x128xf32>, i32 -> vector<24x128xf32>
    %287 = arith.addf %285, %286 : vector<24x128xf32>
    %cst_135 = arith.constant 0.120078385 : f32
    %288 = vector.broadcast %cst_135 : f32 to vector<24x128xf32>
    %289 = arith.mulf %288, %287 : vector<24x128xf32>
    %290 = arith.addf %284, %289 : vector<24x128xf32>
    %cst_136 = arith.constant 0.292081714 : f32
    %291 = vector.broadcast %cst_136 : f32 to vector<24x128xf32>
    %292 = arith.mulf %291, %290 : vector<24x128xf32>
    %c1_i32_137 = arith.constant 1 : i32
    %293 = tpu.dynamic_rotate %290 by %c1_i32_137 dim 0 : vector<24x128xf32>, i32 -> vector<24x128xf32>
    %c23_i32_138 = arith.constant 23 : i32
    %294 = tpu.dynamic_rotate %290 by %c23_i32_138 dim 0 : vector<24x128xf32>, i32 -> vector<24x128xf32>
    %295 = arith.addf %293, %294 : vector<24x128xf32>
    %cst_139 = arith.constant 0.233880758 : f32
    %296 = vector.broadcast %cst_139 : f32 to vector<24x128xf32>
    %297 = arith.mulf %296, %295 : vector<24x128xf32>
    %298 = arith.addf %292, %297 : vector<24x128xf32>
    %c2_i32_140 = arith.constant 2 : i32
    %299 = tpu.dynamic_rotate %290 by %c2_i32_140 dim 0 : vector<24x128xf32>, i32 -> vector<24x128xf32>
    %c22_i32_141 = arith.constant 22 : i32
    %300 = tpu.dynamic_rotate %290 by %c22_i32_141 dim 0 : vector<24x128xf32>, i32 -> vector<24x128xf32>
    %301 = arith.addf %299, %300 : vector<24x128xf32>
    %cst_142 = arith.constant 0.120078385 : f32
    %302 = vector.broadcast %cst_142 : f32 to vector<24x128xf32>
    %303 = arith.mulf %302, %301 : vector<24x128xf32>
    %304 = arith.addf %298, %303 : vector<24x128xf32>
    %cst_143 = arith.constant 0.292081714 : f32
    %305 = vector.broadcast %cst_143 : f32 to vector<24x128xf32>
    %306 = arith.mulf %305, %192 : vector<24x128xf32>
    %c1_i32_144 = arith.constant 1 : i32
    %307 = tpu.dynamic_rotate %192 by %c1_i32_144 dim 1 : vector<24x128xf32>, i32 -> vector<24x128xf32>
    %c127_i32_145 = arith.constant 127 : i32
    %308 = tpu.dynamic_rotate %192 by %c127_i32_145 dim 1 : vector<24x128xf32>, i32 -> vector<24x128xf32>
    %309 = arith.addf %307, %308 : vector<24x128xf32>
    %cst_146 = arith.constant 0.233880758 : f32
    %310 = vector.broadcast %cst_146 : f32 to vector<24x128xf32>
    %311 = arith.mulf %310, %309 : vector<24x128xf32>
    %312 = arith.addf %306, %311 : vector<24x128xf32>
    %c2_i32_147 = arith.constant 2 : i32
    %313 = tpu.dynamic_rotate %192 by %c2_i32_147 dim 1 : vector<24x128xf32>, i32 -> vector<24x128xf32>
    %c126_i32_148 = arith.constant 126 : i32
    %314 = tpu.dynamic_rotate %192 by %c126_i32_148 dim 1 : vector<24x128xf32>, i32 -> vector<24x128xf32>
    %315 = arith.addf %313, %314 : vector<24x128xf32>
    %cst_149 = arith.constant 0.120078385 : f32
    %316 = vector.broadcast %cst_149 : f32 to vector<24x128xf32>
    %317 = arith.mulf %316, %315 : vector<24x128xf32>
    %318 = arith.addf %312, %317 : vector<24x128xf32>
    %cst_150 = arith.constant 0.292081714 : f32
    %319 = vector.broadcast %cst_150 : f32 to vector<24x128xf32>
    %320 = arith.mulf %319, %318 : vector<24x128xf32>
    %c1_i32_151 = arith.constant 1 : i32
    %321 = tpu.dynamic_rotate %318 by %c1_i32_151 dim 0 : vector<24x128xf32>, i32 -> vector<24x128xf32>
    %c23_i32_152 = arith.constant 23 : i32
    %322 = tpu.dynamic_rotate %318 by %c23_i32_152 dim 0 : vector<24x128xf32>, i32 -> vector<24x128xf32>
    %323 = arith.addf %321, %322 : vector<24x128xf32>
    %cst_153 = arith.constant 0.233880758 : f32
    %324 = vector.broadcast %cst_153 : f32 to vector<24x128xf32>
    %325 = arith.mulf %324, %323 : vector<24x128xf32>
    %326 = arith.addf %320, %325 : vector<24x128xf32>
    %c2_i32_154 = arith.constant 2 : i32
    %327 = tpu.dynamic_rotate %318 by %c2_i32_154 dim 0 : vector<24x128xf32>, i32 -> vector<24x128xf32>
    %c22_i32_155 = arith.constant 22 : i32
    %328 = tpu.dynamic_rotate %318 by %c22_i32_155 dim 0 : vector<24x128xf32>, i32 -> vector<24x128xf32>
    %329 = arith.addf %327, %328 : vector<24x128xf32>
    %cst_156 = arith.constant 0.120078385 : f32
    %330 = vector.broadcast %cst_156 : f32 to vector<24x128xf32>
    %331 = arith.mulf %330, %329 : vector<24x128xf32>
    %332 = arith.addf %326, %331 : vector<24x128xf32>
    %333 = arith.mulf %220, %220 : vector<24x128xf32>
    %334 = arith.mulf %248, %248 : vector<24x128xf32>
    %335 = arith.mulf %220, %248 : vector<24x128xf32>
    %336 = arith.subf %276, %333 : vector<24x128xf32>
    %337 = arith.subf %304, %334 : vector<24x128xf32>
    %338 = arith.subf %332, %335 : vector<24x128xf32>
    %cst_157 = arith.constant 2.000000e+00 : f32
    %339 = vector.broadcast %cst_157 : f32 to vector<24x128xf32>
    %340 = arith.mulf %339, %335 : vector<24x128xf32>
    %cst_158 = arith.constant 9.99999974E-5 : f32
    %341 = vector.broadcast %cst_158 : f32 to vector<24x128xf32>
    %342 = arith.addf %340, %341 : vector<24x128xf32>
    %cst_159 = arith.constant 2.000000e+00 : f32
    %343 = vector.broadcast %cst_159 : f32 to vector<24x128xf32>
    %344 = arith.mulf %343, %338 : vector<24x128xf32>
    %cst_160 = arith.constant 8.99999984E-4 : f32
    %345 = vector.broadcast %cst_160 : f32 to vector<24x128xf32>
    %346 = arith.addf %344, %345 : vector<24x128xf32>
    %347 = arith.mulf %342, %346 : vector<24x128xf32>
    %348 = arith.addf %333, %334 : vector<24x128xf32>
    %cst_161 = arith.constant 9.99999974E-5 : f32
    %349 = vector.broadcast %cst_161 : f32 to vector<24x128xf32>
    %350 = arith.addf %348, %349 : vector<24x128xf32>
    %351 = arith.addf %336, %337 : vector<24x128xf32>
    %cst_162 = arith.constant 8.99999984E-4 : f32
    %352 = vector.broadcast %cst_162 : f32 to vector<24x128xf32>
    %353 = arith.addf %351, %352 : vector<24x128xf32>
    %354 = arith.mulf %350, %353 : vector<24x128xf32>
    %355 = tpu.reciprocal %354 {approx = true} : vector<24x128xf32> -> vector<24x128xf32>
    %356 = arith.mulf %354, %355 : vector<24x128xf32>
    %cst_163 = arith.constant 2.000000e+00 : f32
    %357 = vector.broadcast %cst_163 : f32 to vector<24x128xf32>
    %358 = arith.subf %357, %356 : vector<24x128xf32>
    %359 = arith.mulf %355, %358 : vector<24x128xf32>
    %360 = arith.mulf %347, %359 : vector<24x128xf32>
    %cst_164 = arith.constant 1.000000e+00 : f32
    %361 = vector.broadcast %cst_164 : f32 to vector<24x128xf32>
    %362 = arith.subf %361, %360 : vector<24x128xf32>
    %cst_165 = arith.constant 0.000000e+00 : f32
    %cst_166 = arith.constant 1.000000e+00 : f32
    %363 = vector.broadcast %cst_165 : f32 to vector<24x128xf32>
    %364 = arith.maximumf %363, %362 : vector<24x128xf32>
    %365 = vector.broadcast %cst_166 : f32 to vector<24x128xf32>
    %366 = arith.minimumf %365, %364 : vector<24x128xf32>
    %cst_167 = arith.constant 5.000000e-01 : f32
    %367 = vector.broadcast %cst_167 : f32 to vector<24x128xf32>
    %368 = arith.mulf %366, %367 : vector<24x128xf32>
    %c1_168 = arith.constant 1 : index
    %c0_169 = arith.constant 0 : index
    %c0_170 = arith.constant 0 : index
    %369 = vector.load %arg3[%c1_168, %c0_169, %c0_170] : memref<2x24x128xf32, #tpu.memory_space<vmem>>, vector<1x24x128xf32>
    %370 = vector.shape_cast %369 : vector<1x24x128xf32> to vector<24x128xf32>
    %371 = vector.shape_cast %368 : vector<24x128xf32> to vector<1x24x128xf32>
    tpu.vector_store %arg3[%c1_168, %c0_169, %c0_170], %371 {strides = array<i32>} : memref<2x24x128xf32, #tpu.memory_space<vmem>>, vector<1x24x128xf32>,
    return
  }
  func.func @transform_0(%arg0: i32) -> (i32, i32, i32) {
    %c0_i32 = arith.constant 0 : i32
    %c0_i32_0 = arith.constant 0 : i32
    %c0_i32_1 = arith.constant 0 : i32
    return %arg0, %c0_i32, %c0_i32_0 : i32, i32, i32
  }
  func.func @transform_1(%arg0: i32) -> (i32, i32, i32) {
    %c0_i32 = arith.constant 0 : i32
    %c0_i32_0 = arith.constant 0 : i32
    %c0_i32_1 = arith.constant 0 : i32
    return %arg0, %c0_i32, %c0_i32_0 : i32, i32, i32
  }
  func.func @transform_2(%arg0: i32) -> (i32, i32, i32) {
    %c0_i32 = arith.constant 0 : i32
    %c0_i32_0 = arith.constant 0 : i32
    %c0_i32_1 = arith.constant 0 : i32
    return %arg0, %c0_i32, %c0_i32_0 : i32, i32, i32
  }
}

</mosaic_0001>

<bundles_post_ra>
// kernel: tpu_custom_call.1
= control target key start
LH: loop header
LB: loop body
LE: loop exit
PB: predicated region body
PF: predicated region fallthrough
CT: control target
= control target key end

     0   :  { %7 = vsyncpa [#allocation3], 0  ;;  %s2135_s0 = inlined_call_operand.hbm [shape: f32[2,24,128], index: 0, kind: input, shape index: {}]   ;;  %s2136_s1 = inlined_call_operand.hbm [shape: f32[2,24,128], index: 1, kind: input, shape index: {}]   ;;  %s2137_s2 = inlined_call_operand.hbm [shape: f32[2,24,128], index: 2, kind: output, shape index: {}]  }
   0x1   :  { %8 = vsyncpa [#allocation6], 0 }
   0x2   :  { %9 = vsyncpa [#allocation4], 0  ;;  %s1246_s9 = smov [#allocation2]  }
   0x3   :  { %s15_s10 = sshll.u32 %s1246_s9, 4  ;;  %s16_s10 = int_to_ptr.vmem [resolvable:$true] %s15_s10 }
   0x4   :  { %s1188_s11 = scalar_lea.vmem %s16_s10, 768  ;;  %p1193_p1 = scmp.lt.s32.totalorder %s16_s10, %s16_s10 }
   0x5   :  { %p1189_p0 = scmp.ne.s32.totalorder %s16_s10, %s1188_s11  ;;  %p1194_p2 = scmp.lt.s32.totalorder %s1188_s11, %s1188_s11 }
   0x7   :  { %p1195_p3 = por %p1194_p2, %p1193_p1 }
   0x9   :  { %p1196_p4 = pnand %p1195_p3, %p1189_p0 }
   0xb   :  { %1199 = shalt.err (!%p1196_p4)
}
   0xc   :  { %s1247_s12 = smov 128   ;;  %s1248_s13 = smov 8  }
   0xd   :  { %21 = dma.hbm_to_vmem [thread:$0]  %s2135_s0, 768, %s16_s10, [#allocation3], %s1247_s12, %s1247_s12, %s1248_s13  }
   0xe   :  { %s1249_s16 = smov [#allocation5]  }
   0xf   :  { %s27_s17 = sshll.u32 %s1249_s16, 4  ;;  %s28_s17 = int_to_ptr.vmem [resolvable:$true] %s27_s17 }
  0x10   :  { %s1208_s18 = scalar_lea.vmem %s28_s17, 768  ;;  %p1213_p6 = scmp.lt.s32.totalorder %s28_s17, %s28_s17 }
  0x11   :  { %p1209_p5 = scmp.ne.s32.totalorder %s28_s17, %s1208_s18  ;;  %p1214_p7 = scmp.lt.s32.totalorder %s1208_s18, %s1208_s18 }
  0x13   :  { %p1215_p8 = por %p1214_p7, %p1213_p6 }
  0x15   :  { %p1216_p9 = pnand %p1215_p8, %p1209_p5 }
  0x17   :  { %1219 = shalt.err (!%p1216_p9)
}
  0x18   :  { %33 = dma.hbm_to_vmem [thread:$0]  %s2136_s1, 768, %s28_s17, [#allocation6], %s1247_s12, %s1247_s12, %s1248_s13  }
  0x19   :  { %1240 = dma.done.wait [#allocation3], 768  }
  0x1a   :  { %1241 = vsyncadd [#allocation3], 4294966528 }
  0x1b   :  { %1242 = dma.done.wait [#allocation6], 768  }
  0x1c   :  { %1243 = vsyncadd [#allocation6], 4294966528  ;;  %v1282_v0 = vld [vmem:[#allocation2 + $0x10] sm:$0xff]  ;;  %v1284_v1 = vld [vmem:[#allocation2] sm:$0xff]  ;;  %s1250_s0 = smov 1   ;;  %s1251_s1 = smov 127   ;;  %v106_v36 = vlaneseq }
  0x1d   :  { %62 = vrot.lane.b32.xlu1 %v1282_v0, %s1250_s0  ;;  %58 = vrot.lane.b32.xlu0 %v1284_v1, %s1250_s0  ;;  %v1290_v2 = vld [vmem:[#allocation2 + $0x8] sm:$0xff]  ;;  %v1292_v3 = vld [vmem:[#allocation5 + $0x8] sm:$0xff]  ;;  %v1294_v4 = vld [vmem:[#allocation5] sm:$0xff]  ;;  %s1252_s21 = smov 2   ;;  %s1253_s22 = smov 126   ;;  %v1360_v10 = vmul.f32 %v1284_v1, %v1284_v1  ;;  %v1368_v11 = vmul.f32 %v1282_v0, %v1282_v0 }
  0x1e   :  { %v1296_v5 = vld [vmem:[#allocation5 + $0x10] sm:$0xff]  ;;  %v1300_v6 = vmul.f32 %v1292_v3, %v1290_v2  ;;  %v1304_v7 = vmul.f32 %v1294_v4, %v1284_v1  ;;  %v1356_v9 = vmul.f32 %v1290_v2, %v1290_v2  ;;  %v1392_v12 = vmul.f32 %v1292_v3, %v1292_v3  ;;  %v1452_v18 = vld [vmem:[#allocation2 + $0x18] sm:$0xff]  ;;  %v1458_v21 = vld [vmem:[#allocation2 + $0x28] sm:$0xff]  ;;  %s1254_s23 = smov [#allocation7]  }
  0x1f   :  { %v1308_v8 = vmul.f32 %v1296_v5, %v1282_v0  ;;  %v1396_v13 = vmul.f32 %v1294_v4, %v1294_v4  ;;  %v1404_v14 = vmul.f32 %v1296_v5, %v1296_v5  ;;  %v1450_v17 = vld [vmem:[#allocation2 + $0x20] sm:$0xff]  ;;  %v1468_v27 = vld [vmem:[#allocation5 + $0x20] sm:$0xff]  ;;  %v1470_v28 = vld [vmem:[#allocation5 + $0x18] sm:$0xff]  ;;  %v55_v33 = vmul.f32 0.2920817, %v1284_v1  ;;  %s1140_s24 = sshll.u32 %s1254_s23, 4  ;;  %s1141_s24 = int_to_ptr.vmem [resolvable:$true] %s1140_s24 }
  0x20   :  { %v57_v37 = vmul.f32 0.2920817, %v1282_v0  ;;  %v1478_v39 = vld [vmem:[#allocation5 + $0x28] sm:$0xff]  ;;  %v56_v41 = vmul.f32 0.2920817, %v1290_v2  ;;  %v1481_v46 = vshrl.u32 %v106_v36, 7  ;;  %p1225_p11 = scmp.lt.s32.totalorder %s1141_s24, %s1141_s24 }
  0x21   :  { %64 = vrot.lane.b32.xlu1 %v1284_v1, %s1251_s1  ;;  %60 = vrot.lane.b32.xlu0 %v1290_v2, %s1250_s0  ;;  %s1220_s25 = scalar_lea.vmem %s1141_s24, 768 }
  0x22   :  { %vm108_vm0 = vcmp.lt.s32.totalorder %v1481_v46, 1  ;;  %vm115_vm1 = vcmp.lt.s32.totalorder %v1481_v46, 7  ;;  %vm131_vm2 = vcmp.lt.s32.totalorder %v1481_v46, 2  ;;  %vm138_vm3 = vcmp.lt.s32.totalorder %v1481_v46, 6  ;;  %p1221_p10 = scmp.ne.s32.totalorder %s1141_s24, %s1220_s25  ;;  %p1226_p12 = scmp.lt.s32.totalorder %s1220_s25, %s1220_s25 }
  0x24   :  { %p1227_p13 = por %p1226_p12, %p1225_p11 }
  0x25   :  { %68 = vrot.lane.b32.xlu1 %v1282_v0, %s1251_s1  ;;  %66 = vrot.lane.b32.xlu0 %v1290_v2, %s1251_s1 }
  0x26   :  { %p1228_p0 = pnand %p1227_p13, %p1221_p10 }
  0x29   :  { %81 = vrot.lane.b32.xlu1 %v1290_v2, %s1252_s21  ;;  %79 = vrot.lane.b32.xlu0 %v1284_v1, %s1252_s21 }
  0x2d   :  { %85 = vrot.lane.b32.xlu1 %v1284_v1, %s1253_s22  ;;  %83 = vrot.lane.b32.xlu0 %v1282_v0, %s1252_s21 }
  0x31   :  { %89 = vrot.lane.b32.xlu1 %v1282_v0, %s1253_s22  ;;  %87 = vrot.lane.b32.xlu0 %v1290_v2, %s1253_s22 }
  0x35   :  { %156 = vrot.lane.b32.xlu1 %v1292_v3, %s1250_s0  ;;  %154 = vrot.lane.b32.xlu0 %v1294_v4, %s1250_s0 }
  0x39   :  { %160 = vrot.lane.b32.xlu1 %v1294_v4, %s1251_s1  ;;  %158 = vrot.lane.b32.xlu0 %v1296_v5, %s1250_s0 }
  0x3d   :  { %164 = vrot.lane.b32.xlu1 %v1296_v5, %s1251_s1  ;;  %162 = vrot.lane.b32.xlu0 %v1292_v3, %s1251_s1 }
  0x41   :  { %177 = vrot.lane.b32.xlu1 %v1292_v3, %s1252_s21  ;;  %175 = vrot.lane.b32.xlu0 %v1294_v4, %s1252_s21 }
  0x45   :  { %181 = vrot.lane.b32.xlu1 %v1294_v4, %s1253_s22  ;;  %179 = vrot.lane.b32.xlu0 %v1296_v5, %s1252_s21 }
  0x49   :  { %185 = vrot.lane.b32.xlu1 %v1296_v5, %s1253_s22  ;;  %183 = vrot.lane.b32.xlu0 %v1292_v3, %s1253_s22 }
  0x4d   :  { %246 = vrot.lane.b32.xlu1 %v1356_v9, %s1250_s0  ;;  %244 = vrot.lane.b32.xlu0 %v1360_v10, %s1250_s0 }
  0x51   :  { %250 = vrot.lane.b32.xlu1 %v1360_v10, %s1251_s1  ;;  %248 = vrot.lane.b32.xlu0 %v1368_v11, %s1250_s0 }
  0x55   :  { %254 = vrot.lane.b32.xlu1 %v1368_v11, %s1251_s1  ;;  %252 = vrot.lane.b32.xlu0 %v1356_v9, %s1251_s1 }
  0x59   :  { %267 = vrot.lane.b32.xlu1 %v1356_v9, %s1252_s21  ;;  %265 = vrot.lane.b32.xlu0 %v1360_v10, %s1252_s21 }
  0x5d   :  { %271 = vrot.lane.b32.xlu1 %v1360_v10, %s1253_s22  ;;  %269 = vrot.lane.b32.xlu0 %v1368_v11, %s1252_s21 }
  0x61   :  { %275 = vrot.lane.b32.xlu1 %v1368_v11, %s1253_s22  ;;  %273 = vrot.lane.b32.xlu0 %v1356_v9, %s1253_s22 }
  0x65   :  { %336 = vrot.lane.b32.xlu1 %v1392_v12, %s1250_s0  ;;  %334 = vrot.lane.b32.xlu0 %v1396_v13, %s1250_s0 }
  0x69   :  { %340 = vrot.lane.b32.xlu1 %v1396_v13, %s1251_s1  ;;  %338 = vrot.lane.b32.xlu0 %v1404_v14, %s1250_s0 }
  0x6d   :  { %344 = vrot.lane.b32.xlu1 %v1404_v14, %s1251_s1  ;;  %342 = vrot.lane.b32.xlu0 %v1392_v12, %s1251_s1 }
  0x71   :  { %357 = vrot.lane.b32.xlu1 %v1392_v12, %s1252_s21  ;;  %355 = vrot.lane.b32.xlu0 %v1396_v13, %s1252_s21 }
  0x75   :  { %361 = vrot.lane.b32.xlu1 %v1396_v13, %s1253_s22  ;;  %359 = vrot.lane.b32.xlu0 %v1404_v14, %s1252_s21 }
  0x79   :  { %365 = vrot.lane.b32.xlu1 %v1404_v14, %s1253_s22  ;;  %363 = vrot.lane.b32.xlu0 %v1392_v12, %s1253_s22 }
  0x7d   :  { %426 = vrot.lane.b32.xlu1 %v1300_v6, %s1250_s0  ;;  %424 = vrot.lane.b32.xlu0 %v1304_v7, %s1250_s0 }
  0x81   :  { %430 = vrot.lane.b32.xlu1 %v1304_v7, %s1251_s1  ;;  %428 = vrot.lane.b32.xlu0 %v1308_v8, %s1250_s0 }
  0x85   :  { %434 = vrot.lane.b32.xlu1 %v1308_v8, %s1251_s1  ;;  %432 = vrot.lane.b32.xlu0 %v1300_v6, %s1251_s1 }
  0x89   :  { %447 = vrot.lane.b32.xlu1 %v1300_v6, %s1252_s21  ;;  %445 = vrot.lane.b32.xlu0 %v1304_v7, %s1252_s21 }
  0x8d   :  { %451 = vrot.lane.b32.xlu1 %v1304_v7, %s1253_s22  ;;  %449 = vrot.lane.b32.xlu0 %v1308_v8, %s1252_s21 }
  0x8f   :  { %v63_v15 = vpop.permute.xlu1 %62  ;;  %v59_v16 = vpop.permute.xlu0 %58 }
  0x91   :  { %455 = vrot.lane.b32.xlu1 %v1308_v8, %s1253_s22  ;;  %453 = vrot.lane.b32.xlu0 %v1300_v6, %s1253_s22 }
  0x93   :  { %v65_v19 = vpop.permute.xlu1 %64  ;;  %v61_v20 = vpop.permute.xlu0 %60 }
  0x94   :  { %v70_v26 = vadd.f32 %v65_v19, %v59_v16 }
  0x95   :  { %611 = vrot.lane.b32.xlu1 %v1450_v17, %s1250_s0  ;;  %609 = vrot.lane.b32.xlu0 %v1452_v18, %s1250_s0 }
  0x96   :  { %v73_v34 = vmul.f32 0.23388076, %v70_v26 }
  0x97   :  { %v69_v22 = vpop.permute.xlu1 %68  ;;  %v67_v23 = vpop.permute.xlu0 %66 }
  0x98   :  { %v72_v29 = vadd.f32 %v69_v22, %v63_v15  ;;  %v71_v30 = vadd.f32 %v67_v23, %v61_v20  ;;  %v76_v45 = vadd.f32 %v73_v34, %v55_v33 }
  0x99   :  { %615 = vrot.lane.b32.xlu1 %v1452_v18, %s1251_s1  ;;  %613 = vrot.lane.b32.xlu0 %v1458_v21, %s1250_s0 }
  0x9a   :  { %v75_v40 = vmul.f32 0.23388076, %v72_v29  ;;  %v74_v42 = vmul.f32 0.23388076, %v71_v30 }
  0x9b   :  { %v82_v24 = vpop.permute.xlu1 %81  ;;  %v80_v25 = vpop.permute.xlu0 %79 }
  0x9c   :  { %v78_v50 = vadd.f32 %v75_v40, %v57_v37  ;;  %v77_v51 = vadd.f32 %v74_v42, %v56_v41 }
  0x9d   :  { %619 = vrot.lane.b32.xlu1 %v1458_v21, %s1251_s1  ;;  %617 = vrot.lane.b32.xlu0 %v1450_v17, %s1251_s1 }
  0x9f   :  { %v86_v31 = vpop.permute.xlu1 %85  ;;  %v84_v32 = vpop.permute.xlu0 %83 }
  0xa0   :  { %v91_v35 = vadd.f32 %v86_v31, %v80_v25 }
  0xa1   :  { %701 = vrot.lane.b32.xlu1 %v1468_v27, %s1250_s0  ;;  %699 = vrot.lane.b32.xlu0 %v1470_v28, %s1250_s0 }
  0xa2   :  { %v94_v38 = vmul.f32 0.120078385, %v91_v35 }
  0xa3   :  { %v90_v43 = vpop.permute.xlu1 %89  ;;  %v88_v44 = vpop.permute.xlu0 %87 }
  0xa4   :  { %v93_v47 = vadd.f32 %v90_v43, %v84_v32  ;;  %v92_v48 = vadd.f32 %v88_v44, %v82_v24  ;;  %v97_v49 = vadd.f32 %v94_v38, %v76_v45 }
  0xa5   :  { %705 = vrot.lane.b32.xlu1 %v1470_v28, %s1251_s1  ;;  %703 = vrot.lane.b32.xlu0 %v1478_v39, %s1250_s0 }
  0xa6   :  { %v96_v52 = vmul.f32 0.120078385, %v93_v47  ;;  %v95_v53 = vmul.f32 0.120078385, %v92_v48  ;;  %v100_v58 = vmul.f32 0.2920817, %v97_v49 }
  0xa7   :  { %v1487_v54 = vpop.permute.xlu1 %156  ;;  %v155_v55 = vpop.permute.xlu0 %154  ;;  %v103_v59 = vrot.slane %v97_v49, 7  ;;  %v112_v60 = vrot.slane %v97_v49, 1  ;;  %v128_v61 = vrot.slane %v97_v49, 6  ;;  %v135_v62 = vrot.slane %v97_v49, 2 }
  0xa8   :  { %v99_v56 = vadd.f32 %v96_v52, %v78_v50  ;;  %v98_v57 = vadd.f32 %v95_v53, %v77_v51 }
  0xa9   :  { %709 = vrot.lane.b32.xlu1 %v1478_v39, %s1251_s1  ;;  %707 = vrot.lane.b32.xlu0 %v1468_v27, %s1251_s1 }
  0xaa   :  { %v105_v63 = vrot.slane %v99_v56, 7  ;;  %v114_v0 = vrot.slane %v99_v56, 1  ;;  %v130_v1 = vrot.slane %v99_v56, 6  ;;  %v102_v16 = vmul.f32 0.2920817, %v99_v56 }
  0xab   :  { %v161_v2 = vpop.permute.xlu1 %160  ;;  %v159_v15 = vpop.permute.xlu0 %158  ;;  %v137_v19 = vrot.slane %v99_v56, 2  ;;  %v104_v20 = vrot.slane %v98_v57, 7  ;;  %v113_v22 = vrot.slane %v98_v57, 1  ;;  %v129_v26 = vrot.slane %v98_v57, 6 }
  0xac   :  { %v111_v23 = vsel %vm108_vm0, %v105_v63, %v103_v59  ;;  %v118_v24 = vsel %vm115_vm1, %v114_v0, %v112_v60  ;;  %v134_v25 = vsel %vm131_vm2, %v130_v1, %v128_v61  ;;  %v136_v42 = vrot.slane %v98_v57, 2 }
  0xad   :  { %632 = vrot.lane.b32.xlu1 %v1450_v17, %s1252_s21  ;;  %630 = vrot.lane.b32.xlu0 %v1452_v18, %s1252_s21  ;;  %v141_v29 = vsel %vm138_vm3, %v137_v19, %v135_v62  ;;  %v109_v30 = vsel %vm108_vm0, %v104_v20, %v105_v63  ;;  %v110_v31 = vsel %vm108_vm0, %v103_v59, %v104_v20  ;;  %v101_v44 = vmul.f32 0.2920817, %v98_v57 }
  0xae   :  { %v116_v32 = vsel %vm115_vm1, %v113_v22, %v114_v0  ;;  %v117_v33 = vsel %vm115_vm1, %v112_v60, %v113_v22  ;;  %v121_v35 = vadd.f32 %v118_v24, %v109_v30  ;;  %v132_v36 = vsel %vm131_vm2, %v129_v26, %v130_v1 }
  0xaf   :  { %v120_v34 = vadd.f32 %v116_v32, %v110_v31  ;;  %v165_v37 = vpop.permute.xlu1 %164  ;;  %v163_v38 = vpop.permute.xlu0 %162  ;;  %v119_v40 = vadd.f32 %v117_v33, %v111_v23  ;;  %v133_v41 = vsel %vm131_vm2, %v128_v61, %v129_v26  ;;  %v144_v43 = vadd.f32 %v141_v29, %v132_v36 }
  0xb0   :  { %v124_v47 = vmul.f32 0.23388076, %v121_v35  ;;  %v139_v49 = vsel %vm138_vm3, %v136_v42, %v137_v19  ;;  %v140_v50 = vsel %vm138_vm3, %v135_v62, %v136_v42  ;;  %v166_v63 = vadd.f32 %v161_v2, %v155_v55 }
  0xb1   :  { %v123_v45 = vmul.f32 0.23388076, %v120_v34  ;;  %636 = vrot.lane.b32.xlu1 %v1452_v18, %s1253_s22  ;;  %634 = vrot.lane.b32.xlu0 %v1458_v21, %s1252_s21  ;;  %v122_v48 = vmul.f32 0.23388076, %v119_v40  ;;  %v147_v51 = vmul.f32 0.120078385, %v144_v43  ;;  %v142_v56 = vadd.f32 %v140_v50, %v134_v25 }
  0xb2   :  { %v127_v53 = vadd.f32 %v124_v47, %v102_v16  ;;  %v143_v57 = vadd.f32 %v139_v49, %v133_v41  ;;  %v168_v16 = vadd.f32 %v165_v37, %v159_v15  ;;  %v167_v22 = vadd.f32 %v163_v38, %v1487_v54 }
  0xb3   :  { %v126_v52 = vadd.f32 %v123_v45, %v101_v44  ;;  %v178_v59 = vpop.permute.xlu1 %177  ;;  %v176_v60 = vpop.permute.xlu0 %175  ;;  %v125_v61 = vadd.f32 %v122_v48, %v100_v58  ;;  %v145_v0 = vmul.f32 0.120078385, %v142_v56  ;;  %v151_v55 = vmul.f32 0.2920817, %v1294_v4 }
  0xb4   :  { %v146_v1 = vmul.f32 0.120078385, %v143_v57  ;;  %v1529_v20 = vadd.f32 %v147_v51, %v127_v53  ;;  %v169_v2 = vmul.f32 0.23388076, %v166_v63  ;;  %v153_v25 = vmul.f32 0.2920817, %v1296_v5 }
  0xb5   :  { %640 = vrot.lane.b32.xlu1 %v1458_v21, %s1253_s22  ;;  %638 = vrot.lane.b32.xlu0 %v1450_v17, %s1253_s22  ;;  %v1535_v62 = vadd.f32 %v145_v0, %v125_v61  ;;  %v171_v29 = vmul.f32 0.23388076, %v168_v16  ;;  %v152_v15 = vmul.f32 0.2920817, %v1292_v3  ;;  %v170_v30 = vmul.f32 0.23388076, %v167_v22 }
  0xb6   :  { %v1537_v19 = vadd.f32 %v146_v1, %v126_v52  ;;  %v172_v32 = vadd.f32 %v169_v2, %v151_v55  ;;  %v1555_v40 = vmul.f32 %v1450_v17, %v1450_v17  ;;  %v1559_v41 = vmul.f32 %v1452_v18, %v1452_v18 }
  0xb7   :  { %v182_v23 = vpop.permute.xlu1 %181  ;;  %v180_v58 = vpop.permute.xlu0 %179  ;;  %v174_v35 = vadd.f32 %v171_v29, %v153_v25  ;;  %v173_v36 = vadd.f32 %v170_v30, %v152_v15  ;;  %v1567_v44 = vmul.f32 %v1458_v21, %v1458_v21 }
  0xb8   :  { %v187_v24 = vadd.f32 %v182_v23, %v176_v60 }
  0xb9   :  { %722 = vrot.lane.b32.xlu1 %v1468_v27, %s1252_s21  ;;  %720 = vrot.lane.b32.xlu0 %v1470_v28, %s1252_s21 }
  0xba   :  { %v190_v26 = vmul.f32 0.120078385, %v187_v24 }
  0xbb   :  { %v186_v54 = vpop.permute.xlu1 %185  ;;  %v184_v31 = vpop.permute.xlu0 %183 }
  0xbc   :  { %v189_v33 = vadd.f32 %v186_v54, %v180_v58  ;;  %v188_v4 = vadd.f32 %v184_v31, %v178_v59  ;;  %v193_v34 = vadd.f32 %v190_v26, %v172_v32 }
  0xbd   :  { %726 = vrot.lane.b32.xlu1 %v1470_v28, %s1253_s22  ;;  %724 = vrot.lane.b32.xlu0 %v1478_v39, %s1252_s21 }
  0xbe   :  { %v192_v5 = vmul.f32 0.120078385, %v189_v33  ;;  %v191_v37 = vmul.f32 0.120078385, %v188_v4  ;;  %v196_v45 = vmul.f32 0.2920817, %v193_v34 }
  0xbf   :  { %v1551_v38 = vpop.permute.xlu1 %246  ;;  %v245_v3 = vpop.permute.xlu0 %244  ;;  %v199_v47 = vrot.slane %v193_v34, 7  ;;  %v205_v48 = vrot.slane %v193_v34, 1  ;;  %v220_v49 = vrot.slane %v193_v34, 6  ;;  %v226_v50 = vrot.slane %v193_v34, 2 }
  0xc0   :  { %v195_v42 = vadd.f32 %v192_v5, %v174_v35  ;;  %v194_v43 = vadd.f32 %v191_v37, %v173_v36 }
  0xc1   :  { %730 = vrot.lane.b32.xlu1 %v1478_v39, %s1253_s22  ;;  %728 = vrot.lane.b32.xlu0 %v1468_v27, %s1253_s22 }
  0xc2   :  { %v201_v51 = vrot.slane %v195_v42, 7  ;;  %v207_v52 = vrot.slane %v195_v42, 1  ;;  %v222_v53 = vrot.slane %v195_v42, 6  ;;  %v198_v59 = vmul.f32 0.2920817, %v195_v42 }
  0xc3   :  { %v251_v56 = vpop.permute.xlu1 %250  ;;  %v249_v57 = vpop.permute.xlu0 %248  ;;  %v228_v60 = vrot.slane %v195_v42, 2  ;;  %v200_v61 = vrot.slane %v194_v43, 7  ;;  %v206_v63 = vrot.slane %v194_v43, 1  ;;  %v221_v22 = vrot.slane %v194_v43, 6 }
  0xc4   :  { %v204_v0 = vsel %vm108_vm0, %v201_v51, %v199_v47  ;;  %v210_v1 = vsel %vm115_vm1, %v207_v52, %v205_v48  ;;  %v225_v16 = vsel %vm131_vm2, %v222_v53, %v220_v49  ;;  %v227_v32 = vrot.slane %v194_v43, 2 }
  0xc5   :  { %791 = vrot.lane.b32.xlu1 %v1555_v40, %s1250_s0  ;;  %789 = vrot.lane.b32.xlu0 %v1559_v41, %s1250_s0  ;;  %v231_v23 = vsel %vm138_vm3, %v228_v60, %v226_v50  ;;  %v202_v58 = vsel %vm108_vm0, %v200_v61, %v201_v51  ;;  %v203_v55 = vsel %vm108_vm0, %v199_v47, %v200_v61  ;;  %v197_v4 = vmul.f32 0.2920817, %v194_v43 }
  0xc6   :  { %v208_v2 = vsel %vm115_vm1, %v206_v63, %v207_v52  ;;  %v209_v24 = vsel %vm115_vm1, %v205_v48, %v206_v63  ;;  %v213_v26 = vadd.f32 %v210_v1, %v202_v58  ;;  %v223_v29 = vsel %vm131_vm2, %v221_v22, %v222_v53 }
  0xc7   :  { %v212_v25 = vadd.f32 %v208_v2, %v203_v55  ;;  %v255_v15 = vpop.permute.xlu1 %254  ;;  %v253_v30 = vpop.permute.xlu0 %252  ;;  %v211_v54 = vadd.f32 %v209_v24, %v204_v0  ;;  %v224_v31 = vsel %vm131_vm2, %v220_v49, %v221_v22  ;;  %v234_v33 = vadd.f32 %v231_v23, %v223_v29 }
  0xc8   :  { %v216_v35 = vmul.f32 0.23388076, %v213_v26  ;;  %v229_v5 = vsel %vm138_vm3, %v227_v32, %v228_v60  ;;  %v230_v37 = vsel %vm138_vm3, %v226_v50, %v227_v32  ;;  %v241_v61 = vmul.f32 0.2920817, %v1360_v10 }
  0xc9   :  { %v215_v34 = vmul.f32 0.23388076, %v212_v25  ;;  %795 = vrot.lane.b32.xlu1 %v1559_v41, %s1251_s1  ;;  %793 = vrot.lane.b32.xlu0 %v1567_v44, %s1250_s0  ;;  %v214_v36 = vmul.f32 0.23388076, %v211_v54  ;;  %v237_v42 = vmul.f32 0.120078385, %v234_v33  ;;  %v232_v49 = vadd.f32 %v230_v37, %v225_v16 }
  0xca   :  { %v219_v48 = vadd.f32 %v216_v35, %v198_v59  ;;  %v233_v43 = vadd.f32 %v229_v5, %v224_v31  ;;  %v256_v63 = vadd.f32 %v251_v56, %v245_v3  ;;  %v243_v0 = vmul.f32 0.2920817, %v1368_v11 }
  0xcb   :  { %v218_v47 = vadd.f32 %v215_v34, %v197_v4  ;;  %v268_v51 = vpop.permute.xlu1 %267  ;;  %v266_v52 = vpop.permute.xlu0 %265  ;;  %v217_v53 = vadd.f32 %v214_v36, %v196_v45  ;;  %v235_v1 = vmul.f32 0.120078385, %v232_v49  ;;  %v1609_v50 = vmul.f32 %v1468_v27, %v1468_v27 }
  0xcc   :  { %v236_v22 = vmul.f32 0.120078385, %v233_v43  ;;  %v240_v23 = vadd.f32 %v237_v42, %v219_v48  ;;  %v1613_v45 = vmul.f32 %v1529_v20, %v1529_v20  ;;  %v258_v10 = vadd.f32 %v255_v15, %v249_v57 }
  0xcd   :  { %799 = vrot.lane.b32.xlu1 %v1567_v44, %s1251_s1  ;;  %797 = vrot.lane.b32.xlu0 %v1555_v40, %s1251_s1  ;;  %v257_v11 = vadd.f32 %v253_v30, %v1551_v38  ;;  %v1618_v3 = vmul.f32 %v1470_v28, %v1470_v28  ;;  %v238_v56 = vadd.f32 %v235_v1, %v217_v53  ;;  %v259_v57 = vmul.f32 0.23388076, %v256_v63 }
  0xce   :  { %v239_v59 = vadd.f32 %v236_v22, %v218_v47  ;;  %v1620_v60 = vmul.f32 %v240_v23, %v240_v23  ;;  %v1623_v16 = vmul.f32 %v240_v23, %v1529_v20  ;;  %v1627_v2 = vmul.f32 %v1535_v62, %v1535_v62 }
  0xcf   :  { %v272_v58 = vpop.permute.xlu1 %271  ;;  %v270_v55 = vpop.permute.xlu0 %269  ;;  %v1631_v38 = vmul.f32 %v1537_v19, %v1537_v19  ;;  %v1633_v25 = vmul.f32 %v238_v56, %v238_v56  ;;  %v1638_v29 = vmul.f32 %v238_v56, %v1535_v62  ;;  %v242_v30 = vmul.f32 0.2920817, %v1356_v9 }
  0xd0   :  { %v277_v24 = vadd.f32 %v272_v58, %v266_v52  ;;  %v1635_v26 = vmul.f32 %v239_v59, %v239_v59  ;;  %v1641_v20 = vmul.f32 %v239_v59, %v1537_v19  ;;  %v1647_v15 = vadd.f32 %v1620_v60, %v1613_v45 }
  0xd1   :  { %2139 = vst [vmem:[#allocation11_spill] sm:$0xff] %v1638_v29  ;;  %881 = vrot.lane.b32.xlu1 %v1609_v50, %s1250_s0  ;;  %879 = vrot.lane.b32.xlu0 %v1618_v3, %s1250_s0  ;;  %v1654_v62 = vmul.f32 %v1478_v39, %v1478_v39  ;;  %v1658_v19 = vadd.f32 %v1633_v25, %v1627_v2  ;;  %v261_v32 = vmul.f32 0.23388076, %v258_v10  ;;  %v260_v33 = vmul.f32 0.23388076, %v257_v11 }
  0xd2   :  { %v280_v54 = vmul.f32 0.120078385, %v277_v24  ;;  %v1662_v31 = vadd.f32 %v1635_v26, %v1631_v38  ;;  %v262_v34 = vadd.f32 %v259_v57, %v241_v61 }
  0xd3   :  { %v276_v4 = vpop.permute.xlu1 %275  ;;  %v274_v9 = vpop.permute.xlu0 %273  ;;  %v264_v37 = vadd.f32 %v261_v32, %v243_v0  ;;  %v263_v42 = vadd.f32 %v260_v33, %v242_v30 }
  0xd4   :  { %v279_v35 = vadd.f32 %v276_v4, %v270_v55  ;;  %v278_v36 = vadd.f32 %v274_v9, %v268_v51  ;;  %v283_v5 = vadd.f32 %v280_v54, %v262_v34 }
  0xd5   :  { %885 = vrot.lane.b32.xlu1 %v1618_v3, %s1251_s1  ;;  %883 = vrot.lane.b32.xlu0 %v1654_v62, %s1250_s0 }
  0xd6   :  { %v282_v47 = vmul.f32 0.120078385, %v279_v35  ;;  %v281_v48 = vmul.f32 0.120078385, %v278_v36  ;;  %v286_v51 = vmul.f32 0.2920817, %v283_v5 }
  0xd7   :  { %v1668_v49 = vpop.permute.xlu1 %336  ;;  %v335_v43 = vpop.permute.xlu0 %334  ;;  %v289_v61 = vrot.slane %v283_v5, 7  ;;  %v295_v63 = vrot.slane %v283_v5, 1  ;;  %v310_v1 = vrot.slane %v283_v5, 6  ;;  %v316_v22 = vrot.slane %v283_v5, 2 }
  0xd8   :  { %v285_v52 = vadd.f32 %v282_v47, %v264_v37  ;;  %v284_v53 = vadd.f32 %v281_v48, %v263_v42 }
  0xd9   :  { %889 = vrot.lane.b32.xlu1 %v1654_v62, %s1251_s1  ;;  %887 = vrot.lane.b32.xlu0 %v1609_v50, %s1251_s1 }
  0xda   :  { %v291_v0 = vrot.slane %v285_v52, 7  ;;  %v297_v23 = vrot.slane %v285_v52, 1  ;;  %v312_v10 = vrot.slane %v285_v52, 6  ;;  %v288_v59 = vmul.f32 0.2920817, %v285_v52 }
  0xdb   :  { %v341_v11 = vpop.permute.xlu1 %340  ;;  %v339_v56 = vpop.permute.xlu0 %338  ;;  %v318_v58 = vrot.slane %v285_v52, 2  ;;  %v290_v55 = vrot.slane %v284_v53, 7  ;;  %v296_v57 = vrot.slane %v284_v53, 1  ;;  %v311_v32 = vrot.slane %v284_v53, 6 }
  0xdc   :  { %v294_v24 = vsel %vm108_vm0, %v291_v0, %v289_v61  ;;  %v300_v30 = vsel %vm115_vm1, %v297_v23, %v295_v63  ;;  %v315_v54 = vsel %vm131_vm2, %v312_v10, %v310_v1 }
  0xdd   :  { %812 = vrot.lane.b32.xlu1 %v1555_v40, %s1252_s21  ;;  %v321_v33 = vsel %vm138_vm3, %v318_v58, %v316_v22  ;;  %v292_v4 = vsel %vm108_vm0, %v290_v55, %v291_v0  ;;  %v293_v9 = vsel %vm108_vm0, %v289_v61, %v290_v55  ;;  %v298_v34 = vsel %vm115_vm1, %v296_v57, %v297_v23 }
  0xde   :  { %810 = vrot.lane.b32.xlu0 %v1559_v41, %s1252_s21  ;;  %v299_v35 = vsel %vm115_vm1, %v295_v63, %v296_v57  ;;  %v302_v36 = vadd.f32 %v298_v34, %v293_v9  ;;  %v303_v5 = vadd.f32 %v300_v30, %v292_v4  ;;  %v313_v37 = vsel %vm131_vm2, %v311_v32, %v312_v10 }
  0xdf   :  { %v345_v42 = vpop.permute.xlu1 %344  ;;  %v343_v47 = vpop.permute.xlu0 %342  ;;  %v301_v48 = vadd.f32 %v299_v35, %v294_v24  ;;  %v314_v52 = vsel %vm131_vm2, %v310_v1, %v311_v32  ;;  %v317_v61 = vrot.slane %v284_v53, 2  ;;  %v324_v0 = vadd.f32 %v321_v33, %v313_v37 }
  0xe0   :  { %v287_v23 = vmul.f32 0.2920817, %v284_v53  ;;  %v305_v55 = vmul.f32 0.23388076, %v302_v36  ;;  %v306_v29 = vmul.f32 0.23388076, %v303_v5  ;;  %v346_v34 = vadd.f32 %v341_v11, %v335_v43 }
  0xe1   :  { %816 = vrot.lane.b32.xlu1 %v1559_v41, %s1253_s22  ;;  %v304_v63 = vmul.f32 0.23388076, %v301_v48  ;;  %v319_v57 = vsel %vm138_vm3, %v317_v61, %v318_v58  ;;  %v320_v10 = vsel %vm138_vm3, %v316_v22, %v317_v61  ;;  %v327_v30 = vmul.f32 0.120078385, %v324_v0 }
  0xe2   :  { %814 = vrot.lane.b32.xlu0 %v1567_v44, %s1252_s21  ;;  %v308_v1 = vadd.f32 %v305_v55, %v287_v23  ;;  %v309_v24 = vadd.f32 %v306_v29, %v288_v59  ;;  %v322_v32 = vadd.f32 %v320_v10, %v315_v54  ;;  %v323_v53 = vadd.f32 %v319_v57, %v314_v52 }
  0xe3   :  { %v358_v33 = vpop.permute.xlu1 %357  ;;  %v356_v4 = vpop.permute.xlu0 %355  ;;  %v307_v9 = vadd.f32 %v304_v63, %v286_v51  ;;  %v348_v22 = vadd.f32 %v345_v42, %v339_v56  ;;  %v347_v43 = vadd.f32 %v343_v47, %v1668_v49  ;;  %v331_v54 = vmul.f32 0.2920817, %v1396_v13 }
  0xe4   :  { %v325_v35 = vmul.f32 0.120078385, %v322_v32  ;;  %v326_v36 = vmul.f32 0.120078385, %v323_v53  ;;  %v1706_v5 = vadd.f32 %v327_v30, %v309_v24  ;;  %v349_v37 = vmul.f32 0.23388076, %v346_v34 }
  0xe5   :  { %820 = vrot.lane.b32.xlu1 %v1567_v44, %s1253_s22  ;;  %v333_v52 = vmul.f32 0.2920817, %v1404_v14  ;;  %v351_v49 = vmul.f32 0.23388076, %v348_v22  ;;  %v332_v13 = vmul.f32 0.2920817, %v1392_v12  ;;  %v1738_v53 = vmul.f32 %v1468_v27, %v1450_v17 }
  0xe6   :  { %818 = vrot.lane.b32.xlu0 %v1555_v40, %s1253_s22  ;;  %v1712_v58 = vadd.f32 %v325_v35, %v307_v9  ;;  %v1714_v29 = vadd.f32 %v326_v36, %v308_v1  ;;  %v522_v59 = vsub.f32 %v1706_v5, %v1613_v45  ;;  %v350_v47 = vmul.f32 0.23388076, %v347_v43 }
  0xe7   :  { %v362_v51 = vpop.permute.xlu1 %361  ;;  %v360_v11 = vpop.permute.xlu0 %359  ;;  %v352_v55 = vadd.f32 %v349_v37, %v331_v54  ;;  %v354_v14 = vadd.f32 %v351_v49, %v333_v52  ;;  %v1744_v9 = vmul.f32 %v1470_v28, %v1452_v18  ;;  %v1748_v34 = vmul.f32 %v1478_v39, %v1458_v21 }
  0xe8   :  { %v367_v48 = vadd.f32 %v362_v51, %v356_v4  ;;  %v520_v56 = vsub.f32 %v1712_v58, %v1627_v2  ;;  %v353_v30 = vadd.f32 %v350_v47, %v332_v13  ;;  %v2140_v45 = vsub.f32 %v1714_v29, %v1631_v38 }
  0xe9   :  { %902 = vrot.lane.b32.xlu1 %v1609_v50, %s1252_s21  ;;  %v548_v38 = vadd.f32 0.0001, %v1662_v31 }
  0xea   :  { %v370_v61 = vmul.f32 0.120078385, %v367_v48  ;;  %900 = vrot.lane.b32.xlu0 %v1618_v3, %s1252_s21 }
  0xeb   :  { %v366_v0 = vpop.permute.xlu1 %365  ;;  %v364_v23 = vpop.permute.xlu0 %363 }
  0xec   :  { %v369_v63 = vadd.f32 %v366_v0, %v360_v11  ;;  %v368_v57 = vadd.f32 %v364_v23, %v358_v33  ;;  %v373_v10 = vadd.f32 %v370_v61, %v352_v55 }
  0xed   :  { %906 = vrot.lane.b32.xlu1 %v1618_v3, %s1253_s22 }
  0xee   :  { %904 = vrot.lane.b32.xlu0 %v1654_v62, %s1252_s21  ;;  %v372_v1 = vmul.f32 0.120078385, %v369_v63  ;;  %v371_v24 = vmul.f32 0.120078385, %v368_v57  ;;  %v376_v35 = vmul.f32 0.2920817, %v373_v10 }
  0xef   :  { %v1734_v32 = vpop.permute.xlu1 %426  ;;  %v425_v12 = vpop.permute.xlu0 %424  ;;  %v379_v36 = vrot.slane %v373_v10, 7  ;;  %v385_v22 = vrot.slane %v373_v10, 1  ;;  %v400_v43 = vrot.slane %v373_v10, 6  ;;  %v406_v17 = vrot.slane %v373_v10, 2 }
  0xf0   :  { %v375_v4 = vadd.f32 %v372_v1, %v354_v14  ;;  %v374_v33 = vadd.f32 %v371_v24, %v353_v30 }
  0xf1   :  { %910 = vrot.lane.b32.xlu1 %v1654_v62, %s1253_s22 }
  0xf2   :  { %908 = vrot.lane.b32.xlu0 %v1609_v50, %s1253_s22  ;;  %v381_v27 = vrot.slane %v375_v4, 7  ;;  %v387_v51 = vrot.slane %v375_v4, 1  ;;  %v402_v11 = vrot.slane %v375_v4, 6  ;;  %v378_v48 = vmul.f32 0.2920817, %v375_v4 }
  0xf3   :  { %v431_v54 = vpop.permute.xlu1 %430  ;;  %v429_v37 = vpop.permute.xlu0 %428  ;;  %v408_v18 = vrot.slane %v375_v4, 2  ;;  %v380_v28 = vrot.slane %v374_v33, 7  ;;  %v386_v52 = vrot.slane %v374_v33, 1  ;;  %v401_v49 = vrot.slane %v374_v33, 6 }
  0xf4   :  { %v384_v21 = vsel %vm108_vm0, %v381_v27, %v379_v36  ;;  %v390_v39 = vsel %vm115_vm1, %v387_v51, %v385_v22  ;;  %v405_v61 = vsel %vm131_vm2, %v402_v11, %v400_v43  ;;  %v407_v4 = vrot.slane %v374_v33, 2 }
  0xf5   :  { %971 = vrot.lane.b32.xlu1 %v1738_v53, %s1250_s0  ;;  %v411_v13 = vsel %vm138_vm3, %v408_v18, %v406_v17  ;;  %v382_v47 = vsel %vm108_vm0, %v380_v28, %v381_v27  ;;  %v383_v0 = vsel %vm108_vm0, %v379_v36, %v380_v28  ;;  %v388_v23 = vsel %vm115_vm1, %v386_v52, %v387_v51 }
  0xf6   :  { %969 = vrot.lane.b32.xlu0 %v1744_v9, %s1250_s0  ;;  %v389_v55 = vsel %vm115_vm1, %v385_v22, %v386_v52  ;;  %v392_v63 = vadd.f32 %v388_v23, %v383_v0  ;;  %v393_v57 = vadd.f32 %v390_v39, %v382_v47  ;;  %v403_v10 = vsel %vm131_vm2, %v401_v49, %v402_v11 }
  0xf7   :  { %v435_v14 = vpop.permute.xlu1 %434  ;;  %v433_v30 = vpop.permute.xlu0 %432  ;;  %v391_v1 = vadd.f32 %v389_v55, %v384_v21  ;;  %v404_v24 = vsel %vm131_vm2, %v400_v43, %v401_v49  ;;  %v414_v36 = vadd.f32 %v411_v13, %v403_v10  ;;  %v377_v27 = vmul.f32 0.2920817, %v374_v33 }
  0xf8   :  { %v395_v51 = vmul.f32 0.23388076, %v392_v63  ;;  %v396_v28 = vmul.f32 0.23388076, %v393_v57  ;;  %v436_v42 = vadd.f32 %v431_v54, %v425_v12  ;;  %v409_v52 = vsel %vm138_vm3, %v407_v4, %v408_v18 }
  0xf9   :  { %975 = vrot.lane.b32.xlu1 %v1744_v9, %s1251_s1  ;;  %v394_v22 = vmul.f32 0.23388076, %v391_v1  ;;  %v410_v11 = vsel %vm138_vm3, %v406_v17, %v407_v4  ;;  %v417_v21 = vmul.f32 0.120078385, %v414_v36  ;;  %v413_v49 = vadd.f32 %v409_v52, %v404_v24 }
  0xfa   :  { %973 = vrot.lane.b32.xlu0 %v1748_v34, %s1250_s0  ;;  %v398_v43 = vadd.f32 %v395_v51, %v377_v27  ;;  %v399_v39 = vadd.f32 %v396_v28, %v378_v48  ;;  %v412_v33 = vadd.f32 %v410_v11, %v405_v61  ;;  %v421_v18 = vmul.f32 0.2920817, %v1304_v7 }
  0xfb   :  { %v448_v13 = vpop.permute.xlu1 %447  ;;  %v446_v12 = vpop.permute.xlu0 %445  ;;  %v397_v54 = vadd.f32 %v394_v22, %v376_v35  ;;  %v416_v0 = vmul.f32 0.120078385, %v413_v49  ;;  %v439_v17 = vmul.f32 0.23388076, %v436_v42  ;;  %v438_v55 = vadd.f32 %v435_v14, %v429_v37 }
  0xfc   :  { %v415_v47 = vmul.f32 0.120078385, %v412_v33  ;;  %v420_v23 = vadd.f32 %v417_v21, %v399_v39  ;;  %v437_v57 = vadd.f32 %v433_v30, %v1734_v32  ;;  %v423_v1 = vmul.f32 0.2920817, %v1308_v8 }
  0xfd   :  { %979 = vrot.lane.b32.xlu1 %v1748_v34, %s1251_s1  ;;  %v419_v48 = vadd.f32 %v416_v0, %v398_v43  ;;  %v422_v37 = vmul.f32 0.2920817, %v1300_v6  ;;  %v441_v32 = vmul.f32 0.23388076, %v438_v55  ;;  %v549_v8 = vadd.f32 0.0001, %v1647_v15 }
  0xfe   :  { %977 = vrot.lane.b32.xlu0 %v1738_v53, %s1251_s1  ;;  %v418_v63 = vadd.f32 %v415_v47, %v397_v54  ;;  %v525_v61 = vsub.f32 %v420_v23, %v1620_v60  ;;  %v442_v60 = vadd.f32 %v439_v17, %v421_v18  ;;  %v440_v6 = vmul.f32 0.23388076, %v437_v57 }
  0xff   :  { %v452_v35 = vpop.permute.xlu1 %451  ;;  %v450_v10 = vpop.permute.xlu0 %449  ;;  %v524_v7 = vsub.f32 %v419_v48, %v1635_v26  ;;  %v547_v15 = vadd.f32 0.0001, %v1658_v19  ;;  %v444_v29 = vadd.f32 %v441_v32, %v423_v1 }
 0x100   :  { %v457_v24 = vadd.f32 %v452_v35, %v446_v12  ;;  %v523_v4 = vsub.f32 %v418_v63, %v1633_v25  ;;  %v552_v42 = vadd.f32 %v525_v61, %v522_v59 }
 0x101   :  { %992 = vrot.lane.b32.xlu1 %v1738_v53, %s1252_s21  ;;  %v551_v26 = vadd.f32 %v524_v7, %v2140_v45 }
 0x102   :  { %v460_v14 = vmul.f32 0.120078385, %v457_v24  ;;  %990 = vrot.lane.b32.xlu0 %v1744_v9, %s1252_s21  ;;  %v550_v25 = vadd.f32 %v523_v4, %v520_v56  ;;  %v555_v30 = vadd.f32 0.0009, %v552_v42  ;;  %v443_v56 = vadd.f32 %v440_v6, %v422_v37 }
 0x103   :  { %v456_v5 = vpop.permute.xlu1 %455  ;;  %v454_v59 = vpop.permute.xlu0 %453  ;;  %v554_v28 = vadd.f32 0.0009, %v551_v26 }
 0x104   :  { %v1809_v36 = vadd.f32 %v460_v14, %v442_v60  ;;  %v459_v27 = vadd.f32 %v456_v5, %v450_v10  ;;  %v458_v51 = vadd.f32 %v454_v59, %v448_v13  ;;  %v553_v2 = vadd.f32 0.0009, %v550_v25 }
 0x105   :  { %996 = vrot.lane.b32.xlu1 %v1744_v9, %s1253_s22  ;;  %v1814_v58 = vmul.f32 %v555_v30, %v549_v8  ;;  %v1822_v33 = vmul.f32 %v554_v28, %v548_v38 }
 0x106   :  { %994 = vrot.lane.b32.xlu0 %v1748_v34, %s1252_s21  ;;  %v462_v22 = vmul.f32 0.120078385, %v459_v27  ;;  %v461_v52 = vmul.f32 0.120078385, %v458_v51  ;;  %v1819_v43 = vmul.f32 %v553_v2, %v547_v15  ;;  %v466_v39 = vmul.f32 0.2920817, %v1809_v36 }
 0x107   :  { %v612_v11 = vpop.permute.xlu1 %611  ;;  %v610_v21 = vpop.permute.xlu0 %609  ;;  %1162 = vrcp.f32 %v1814_v58  ;;  %v469_v19 = vrot.slane %v1809_v36, 7  ;;  %v475_v13 = vrot.slane %v1809_v36, 1  ;;  %v490_v12 = vrot.slane %v1809_v36, 6 }
 0x108   :  { %v465_v31 = vadd.f32 %v462_v22, %v444_v29  ;;  %v464_v49 = vadd.f32 %v461_v52, %v443_v56  ;;  %1164 = vrcp.f32 %v1819_v43  ;;  %v496_v54 = vrot.slane %v1809_v36, 2 }
 0x109   :  { %1000 = vrot.lane.b32.xlu1 %v1748_v34, %s1253_s22  ;;  %1166 = vrcp.f32 %v1822_v33 }
 0x10a   :  { %998 = vrot.lane.b32.xlu0 %v1738_v53, %s1253_s22  ;;  %v468_v47 = vmul.f32 0.2920817, %v465_v31  ;;  %v471_v0 = vrot.slane %v465_v31, 7  ;;  %v477_v23 = vrot.slane %v465_v31, 1  ;;  %v492_v18 = vrot.slane %v465_v31, 6 }
 0x10b   :  { %v616_v17 = vpop.permute.xlu1 %615  ;;  %v614_v55 = vpop.permute.xlu0 %613  ;;  %v498_v63 = vrot.slane %v465_v31, 2  ;;  %v467_v48 = vmul.f32 0.2920817, %v464_v49  ;;  %v470_v61 = vrot.slane %v464_v49, 7  ;;  %v476_v57 = vrot.slane %v464_v49, 1 }
 0x10c   :  { %v474_v35 = vsel %vm108_vm0, %v471_v0, %v469_v19  ;;  %v480_v10 = vsel %vm115_vm1, %v477_v23, %v475_v13  ;;  %v495_v1 = vsel %vm131_vm2, %v492_v18, %v490_v12  ;;  %v491_v24 = vrot.slane %v464_v49, 6 }
 0x10d   :  { %v501_v4 = vsel %vm138_vm3, %v498_v63, %v496_v54  ;;  %v472_v7 = vsel %vm108_vm0, %v470_v61, %v471_v0  ;;  %v473_v42 = vsel %vm108_vm0, %v469_v19, %v470_v61  ;;  %v478_v37 = vsel %vm115_vm1, %v476_v57, %v477_v23 }
 0x10e   :  { %v479_v60 = vsel %vm115_vm1, %v475_v13, %v476_v57  ;;  %v482_v32 = vadd.f32 %v478_v37, %v473_v42  ;;  %v483_v14 = vadd.f32 %v480_v10, %v472_v7  ;;  %v493_v8 = vsel %vm131_vm2, %v491_v24, %v492_v18  ;;  %v2141_v10 = vld [vmem:[#allocation11_spill] sm:$0xff] }
 0x10f   :  { %v620_v25 = vpop.permute.xlu1 %619  ;;  %v618_v45 = vpop.permute.xlu0 %617  ;;  %v481_v26 = vadd.f32 %v479_v60, %v474_v35  ;;  %v494_v6 = vsel %vm131_vm2, %v490_v12, %v491_v24  ;;  %v497_v5 = vrot.slane %v464_v49, 2  ;;  %v504_v59 = vadd.f32 %v501_v4, %v493_v8 }
 0x110   :  { %v485_v30 = vmul.f32 0.23388076, %v482_v32  ;;  %v486_v36 = vmul.f32 0.23388076, %v483_v14  ;;  %v1855_v27 = vadd.f32 %v616_v17, %v610_v21  ;;  %v1857_v51 = vadd.f32 %v620_v25, %v614_v55 }
 0x111   :  { %v484_v28 = vmul.f32 0.23388076, %v481_v26  ;;  %v499_v15 = vsel %vm138_vm3, %v497_v5, %v498_v63  ;;  %v500_v2 = vsel %vm138_vm3, %v496_v54, %v497_v5  ;;  %v507_v38 = vmul.f32 0.120078385, %v504_v59 }
 0x112   :  { %v488_v29 = vadd.f32 %v485_v30, %v467_v48  ;;  %v489_v56 = vadd.f32 %v486_v36, %v468_v47  ;;  %v502_v22 = vadd.f32 %v500_v2, %v495_v1  ;;  %v503_v52 = vadd.f32 %v499_v15, %v494_v6 }
 0x113   :  { %v702_v19 = vpop.permute.xlu1 %701  ;;  %v700_v31 = vpop.permute.xlu0 %699  ;;  %v487_v49 = vadd.f32 %v484_v28, %v466_v39  ;;  %v1863_v13 = vadd.f32 %v618_v45, %v612_v11  ;;  %v531_v17 = vmul.f32 2.0, %v1623_v16  ;;  %v530_v11 = vmul.f32 2.0, %v1641_v20 }
 0x114   :  { %v1163_v21 = vpop.eup %1162  ;;  %v505_v12 = vmul.f32 0.120078385, %v502_v22  ;;  %v506_v0 = vmul.f32 0.120078385, %v503_v52  ;;  %v510_v23 = vadd.f32 %v507_v38, %v489_v56  ;;  %v529_v1 = vmul.f32 2.0, %v2141_v10 }
 0x115   :  { %v1165_v18 = vpop.eup %1164  ;;  %v564_v55 = vmul.f32 %v1163_v21, %v1814_v58  ;;  %v534_v37 = vadd.f32 0.0001, %v531_v17  ;;  %v533_v5 = vadd.f32 0.0001, %v530_v11 }
 0x116   :  { %v1167_v54 = vpop.eup %1166  ;;  %v508_v63 = vadd.f32 %v505_v12, %v487_v49  ;;  %v509_v48 = vadd.f32 %v506_v0, %v488_v29  ;;  %v528_v57 = vsub.f32 %v510_v23, %v1623_v16  ;;  %v562_v39 = vmul.f32 %v1165_v18, %v1819_v43  ;;  %v1174_v49 = vld [vmem:[#allocation2 + $0x18] sm:$0xff] }
 0x117   :  { %v706_v47 = vpop.permute.xlu1 %705  ;;  %v704_v61 = vpop.permute.xlu0 %703  ;;  %v563_v24 = vmul.f32 %v1167_v54, %v1822_v33  ;;  %v567_v42 = vsub.f32 2.0, %v564_v55  ;;  %v532_v6 = vadd.f32 0.0001, %v529_v1  ;;  %v606_v12 = vmul.f32 0.2920817, %v1174_v49  ;;  %v1177_v1 = vld [vmem:[#allocation5 + $0x18] sm:$0xff] }
 0x118   :  { %v711_v35 = vadd.f32 %v706_v47, %v700_v31  ;;  %v527_v4 = vsub.f32 %v509_v48, %v1641_v20  ;;  %v526_v58 = vsub.f32 %v508_v63, %v2141_v10  ;;  %v537_v7 = vmul.f32 2.0, %v528_v57  ;;  %v1176_v47 = vld [vmem:[#allocation2 + $0x20] sm:$0xff] }
 0x119   :  { %v565_v60 = vsub.f32 2.0, %v562_v39  ;;  %v566_v25 = vsub.f32 2.0, %v563_v24  ;;  %v570_v30 = vmul.f32 %v1163_v21, %v567_v42  ;;  %v1175_v21 = vld [vmem:[#allocation2 + $0x28] sm:$0xff]  ;;  %v626_v10 = vmul.f32 0.23388076, %v1857_v51 }
 0x11a   :  { %v536_v32 = vmul.f32 2.0, %v527_v4  ;;  %v535_v8 = vmul.f32 2.0, %v526_v58  ;;  %v540_v43 = vadd.f32 0.0009, %v537_v7  ;;  %v696_v24 = vmul.f32 0.2920817, %v1177_v1 }
 0x11b   :  { %v710_v14 = vpop.permute.xlu1 %709  ;;  %v708_v16 = vpop.permute.xlu0 %707  ;;  %v568_v36 = vmul.f32 %v1165_v18, %v565_v60  ;;  %v569_v29 = vmul.f32 %v1167_v54, %v566_v25  ;;  %v608_v18 = vmul.f32 0.2920817, %v1175_v21 }
 0x11c   :  { %v713_v45 = vadd.f32 %v710_v14, %v704_v61  ;;  %v1874_v26 = vadd.f32 %v708_v16, %v702_v19  ;;  %v539_v33 = vadd.f32 0.0009, %v536_v32  ;;  %v538_v59 = vadd.f32 0.0009, %v535_v8 }
 0x11d   :  { %v543_v20 = vmul.f32 %v540_v43, %v534_v37  ;;  %v624_v19 = vmul.f32 0.23388076, %v1855_v27  ;;  %v607_v61 = vmul.f32 0.2920817, %v1176_v47  ;;  %v625_v27 = vmul.f32 0.23388076, %v1863_v13 }
 0x11e   :  { %v541_v2 = vmul.f32 %v538_v59, %v532_v6  ;;  %v542_v38 = vmul.f32 %v539_v33, %v533_v5  ;;  %v714_v32 = vmul.f32 0.23388076, %v711_v35  ;;  %v1178_v43 = vld [vmem:[#allocation5 + $0x28] sm:$0xff]  ;;  %v716_v6 = vmul.f32 0.23388076, %v713_v45  ;;  %v1179_v35 = vld [vmem:[#allocation5 + $0x20] sm:$0xff] }
 0x11f   :  { %v633_v28 = vpop.permute.xlu1 %632  ;;  %v631_v15 = vpop.permute.xlu0 %630  ;;  %v573_v56 = vmul.f32 %v570_v30, %v543_v20  ;;  %v627_v11 = vadd.f32 %v624_v19, %v606_v12  ;;  %v698_v25 = vmul.f32 0.2920817, %v1178_v43  ;;  %v629_v33 = vadd.f32 %v626_v10, %v608_v18 }
 0x120   :  { %v571_v22 = vmul.f32 %v568_v36, %v541_v2  ;;  %v572_v52 = vmul.f32 %v569_v29, %v542_v38  ;;  %v628_v59 = vadd.f32 %v625_v27, %v607_v61  ;;  %v1881_v2 = vmul.f32 0.2920817, %v1179_v35 }
 0x121   :  { %v576_v31 = vsub.f32 1.0, %v573_v56  ;;  %v719_v38 = vadd.f32 %v716_v6, %v698_v25 }
 0x122   :  { %v574_v17 = vsub.f32 1.0, %v571_v22  ;;  %v575_v55 = vsub.f32 1.0, %v572_v52 }
 0x123   :  { %v637_v0 = vpop.permute.xlu1 %636  ;;  %v635_v23 = vpop.permute.xlu0 %634  ;;  %v579_v63 = vmax.f32 %v576_v31, 0.0 }
 0x124   :  { %v642_v48 = vadd.f32 %v637_v0, %v631_v15  ;;  %v577_v57 = vmax.f32 %v574_v17, 0.0  ;;  %v578_v54 = vmax.f32 %v575_v55, 0.0  ;;  %v717_v15 = vadd.f32 %v714_v32, %v696_v24 }
 0x125   :  { %v582_v39 = vmin.f32 %v579_v63, 1.0 }
 0x126   :  { %v645_v4 = vmul.f32 0.120078385, %v642_v48  ;;  %v580_v42 = vmin.f32 %v577_v57, 1.0  ;;  %v581_v37 = vmin.f32 %v578_v54, 1.0 }
 0x127   :  { %v641_v58 = vpop.permute.xlu1 %640  ;;  %v639_v7 = vpop.permute.xlu0 %638  ;;  %v585_v60 = vmul.f32 0.5, %v582_v39 }
 0x128   :  { %v1879_v14 = vadd.f32 %v645_v4, %v627_v11  ;;  %v644_v16 = vadd.f32 %v641_v58, %v635_v23  ;;  %v643_v8 = vadd.f32 %v639_v7, %v633_v28  ;;  %v583_v5 = vmul.f32 0.5, %v580_v42 }
 0x129   :  { %v584_v51 = vmul.f32 0.5, %v581_v37  ;;  %588 = vst [vmem:[#allocation7 + $0x10] sm:$0xff] %v585_v60  ;;  %v1884_v28 = vmul.f32 0.23388076, %v1874_v26 }
 0x12a   :  { %v647_v20 = vmul.f32 0.120078385, %v644_v16  ;;  %v646_v13 = vmul.f32 0.120078385, %v643_v8  ;;  %586 = vst [vmem:[#allocation7] sm:$0xff] %v583_v5  ;;  %v654_v22 = vrot.slane %v1879_v14, 7 }
 0x12b   :  { %v723_v30 = vpop.permute.xlu1 %722  ;;  %v721_v36 = vpop.permute.xlu0 %720  ;;  %587 = vst [vmem:[#allocation7 + $0x8] sm:$0xff] %v584_v51  ;;  %v651_v45 = vmul.f32 0.2920817, %v1879_v14  ;;  %v660_v52 = vrot.slane %v1879_v14, 1  ;;  %v675_v31 = vrot.slane %v1879_v14, 6  ;;  %v681_v49 = vrot.slane %v1879_v14, 2 }
 0x12c   :  { %v650_v29 = vadd.f32 %v647_v20, %v629_v33  ;;  %v649_v56 = vadd.f32 %v646_v13, %v628_v59 }
 0x12e   :  { %v653_v12 = vmul.f32 0.2920817, %v650_v29  ;;  %v656_v19 = vrot.slane %v650_v29, 7  ;;  %v662_v0 = vrot.slane %v650_v29, 1  ;;  %v677_v23 = vrot.slane %v650_v29, 6 }
 0x12f   :  { %v727_v17 = vpop.permute.xlu1 %726  ;;  %v725_v26 = vpop.permute.xlu0 %724  ;;  %v683_v55 = vrot.slane %v650_v29, 2  ;;  %v652_v63 = vmul.f32 0.2920817, %v649_v56  ;;  %v655_v21 = vrot.slane %v649_v56, 7  ;;  %v661_v18 = vrot.slane %v649_v56, 1 }
 0x130   :  { %v659_v48 = vsel %vm108_vm0, %v656_v19, %v654_v22  ;;  %v665_v47 = vsel %vm115_vm1, %v662_v0, %v660_v52  ;;  %v680_v61 = vsel %vm131_vm2, %v677_v23, %v675_v31  ;;  %v676_v57 = vrot.slane %v649_v56, 6 }
 0x131   :  { %v686_v54 = vsel %vm138_vm3, %v683_v55, %v681_v49  ;;  %v657_v39 = vsel %vm108_vm0, %v655_v21, %v656_v19  ;;  %v658_v11 = vsel %vm108_vm0, %v654_v22, %v655_v21  ;;  %v663_v10 = vsel %vm115_vm1, %v661_v18, %v662_v0 }
 0x132   :  { %v664_v1 = vsel %vm115_vm1, %v660_v52, %v661_v18  ;;  %v667_v24 = vadd.f32 %v663_v10, %v658_v11  ;;  %v668_v4 = vadd.f32 %v665_v47, %v657_v39  ;;  %v678_v27 = vsel %vm131_vm2, %v676_v57, %v677_v23 }
 0x133   :  { %v731_v58 = vpop.permute.xlu1 %730  ;;  %v729_v7 = vpop.permute.xlu0 %728  ;;  %v666_v42 = vadd.f32 %v664_v1, %v659_v48  ;;  %v679_v37 = vsel %vm131_vm2, %v675_v31, %v676_v57  ;;  %v682_v60 = vrot.slane %v649_v56, 2  ;;  %v689_v32 = vadd.f32 %v686_v54, %v678_v27 }
 0x134   :  { %v670_v14 = vmul.f32 0.23388076, %v667_v24  ;;  %v671_v16 = vmul.f32 0.23388076, %v668_v4  ;;  %v732_v8 = vadd.f32 %v727_v17, %v721_v36  ;;  %v734_v43 = vadd.f32 %v731_v58, %v725_v26 }
 0x135   :  { %v669_v25 = vmul.f32 0.23388076, %v666_v42  ;;  %v684_v6 = vsel %vm138_vm3, %v682_v60, %v683_v55  ;;  %v685_v5 = vsel %vm138_vm3, %v681_v49, %v682_v60  ;;  %v692_v51 = vmul.f32 0.120078385, %v689_v32 }
 0x136   :  { %v673_v33 = vadd.f32 %v670_v14, %v652_v63  ;;  %v674_v59 = vadd.f32 %v671_v16, %v653_v12  ;;  %v687_v20 = vadd.f32 %v685_v5, %v680_v61  ;;  %v688_v13 = vadd.f32 %v684_v6, %v679_v37 }
 0x137   :  { %v1915_v35 = vpop.permute.xlu1 %791  ;;  %v1917_v29 = vpop.permute.xlu0 %789  ;;  %v672_v56 = vadd.f32 %v669_v25, %v651_v45  ;;  %v735_v22 = vmul.f32 0.120078385, %v732_v8  ;;  %v737_v36 = vmul.f32 0.120078385, %v734_v43  ;;  %v733_v52 = vadd.f32 %v729_v7, %v723_v30 }
 0x138   :  { %v690_v31 = vmul.f32 0.120078385, %v687_v20  ;;  %v691_v19 = vmul.f32 0.120078385, %v688_v13  ;;  %v1919_v0 = vadd.f32 %v692_v51, %v674_v59  ;;  %v718_v45 = vadd.f32 %v1884_v28, %v1881_v2 }
 0x139   :  { %v738_v23 = vadd.f32 %v735_v22, %v717_v15  ;;  %v740_v17 = vadd.f32 %v737_v36, %v719_v38  ;;  %v736_v12 = vmul.f32 0.120078385, %v733_v52 }
 0x13a   :  { %v1921_v49 = vadd.f32 %v690_v31, %v672_v56  ;;  %v1923_v26 = vadd.f32 %v691_v19, %v673_v33 }
 0x13b   :  { %v1925_v55 = vpop.permute.xlu1 %795  ;;  %v1927_v63 = vpop.permute.xlu0 %793  ;;  %v744_v21 = vrot.slane %v738_v23, 7  ;;  %v750_v30 = vrot.slane %v738_v23, 1  ;;  %v765_v18 = vrot.slane %v738_v23, 6  ;;  %v771_v48 = vrot.slane %v738_v23, 2 }
 0x13c   :  { %v746_v47 = vrot.slane %v740_v17, 7  ;;  %v752_v61 = vrot.slane %v740_v17, 1  ;;  %v767_v15 = vrot.slane %v740_v17, 6  ;;  %v773_v38 = vrot.slane %v740_v17, 2 }
 0x13d   :  { %v739_v57 = vadd.f32 %v736_v12, %v718_v45  ;;  %v741_v1 = vmul.f32 0.2920817, %v738_v23  ;;  %v743_v58 = vmul.f32 0.2920817, %v740_v17 }
 0x13e   :  { %v749_v11 = vsel %vm108_vm0, %v746_v47, %v744_v21  ;;  %v755_v10 = vsel %vm115_vm1, %v752_v61, %v750_v30  ;;  %v770_v2 = vsel %vm131_vm2, %v767_v15, %v765_v18  ;;  %v776_v28 = vsel %vm138_vm3, %v773_v38, %v771_v48 }
 0x13f   :  { %v800_v54 = vpop.permute.xlu1 %799  ;;  %v798_v39 = vpop.permute.xlu0 %797  ;;  %v745_v24 = vrot.slane %v739_v57, 7  ;;  %v751_v4 = vrot.slane %v739_v57, 1  ;;  %v766_v27 = vrot.slane %v739_v57, 6  ;;  %v742_v7 = vmul.f32 0.2920817, %v739_v57 }
 0x140   :  { %v772_v42 = vrot.slane %v739_v57, 2 }
 0x141   :  { %v747_v37 = vsel %vm108_vm0, %v745_v24, %v746_v47  ;;  %v748_v60 = vsel %vm108_vm0, %v744_v21, %v745_v24  ;;  %v753_v32 = vsel %vm115_vm1, %v751_v4, %v752_v61  ;;  %v754_v14 = vsel %vm115_vm1, %v750_v30, %v751_v4 }
 0x142   :  { %v756_v8 = vadd.f32 %v754_v14, %v749_v11  ;;  %v757_v43 = vadd.f32 %v753_v32, %v748_v60  ;;  %v758_v25 = vadd.f32 %v755_v10, %v747_v37  ;;  %v768_v6 = vsel %vm131_vm2, %v766_v27, %v767_v15 }
 0x143   :  { %v882_v16 = vpop.permute.xlu1 %881  ;;  %v880_v5 = vpop.permute.xlu0 %879  ;;  %v769_v51 = vsel %vm131_vm2, %v765_v18, %v766_v27  ;;  %v774_v33 = vsel %vm138_vm3, %v772_v42, %v773_v38  ;;  %v775_v59 = vsel %vm138_vm3, %v771_v48, %v772_v42  ;;  %v779_v20 = vadd.f32 %v776_v28, %v768_v6 }
 0x144   :  { %v759_v13 = vmul.f32 0.23388076, %v756_v8  ;;  %v760_v56 = vmul.f32 0.23388076, %v757_v43  ;;  %v761_v22 = vmul.f32 0.23388076, %v758_v25  ;;  %v777_v36 = vadd.f32 %v775_v59, %v770_v2 }
 0x145   :  { %v778_v52 = vadd.f32 %v774_v33, %v769_v51  ;;  %v782_v31 = vmul.f32 0.120078385, %v779_v20  ;;  %v1957_v61 = vmul.f32 %v1921_v49, %v1921_v49  ;;  %v1961_v48 = vmul.f32 %v1919_v0, %v1919_v0 }
 0x146   :  { %v762_v23 = vadd.f32 %v759_v13, %v741_v1  ;;  %v763_v17 = vadd.f32 %v760_v56, %v742_v7  ;;  %v764_v12 = vadd.f32 %v761_v22, %v743_v58  ;;  %v780_v45 = vmul.f32 0.120078385, %v777_v36 }
 0x147   :  { %v886_v19 = vpop.permute.xlu1 %885  ;;  %v884_v21 = vpop.permute.xlu0 %883  ;;  %v781_v30 = vmul.f32 0.120078385, %v778_v52  ;;  %v1975_v1 = vmul.f32 %v1923_v26, %v1923_v26  ;;  %v801_v58 = vadd.f32 %v1925_v55, %v1917_v29  ;;  %v803_v60 = vadd.f32 %v800_v54, %v1927_v63 }
 0x148   :  { %v783_v18 = vadd.f32 %v780_v45, %v762_v23  ;;  %v785_v47 = vadd.f32 %v782_v31, %v764_v12  ;;  %v802_v32 = vadd.f32 %v798_v39, %v1915_v35  ;;  %v891_v8 = vadd.f32 %v886_v19, %v880_v5 }
 0x149   :  { %v784_v15 = vadd.f32 %v781_v30, %v763_v17  ;;  %v804_v37 = vmul.f32 0.23388076, %v801_v58  ;;  %v788_v51 = vmul.f32 0.2920817, %v1567_v44  ;;  %v806_v20 = vmul.f32 0.23388076, %v803_v60 }
 0x14a   :  { %v1963_v57 = vmul.f32 %v783_v18, %v783_v18  ;;  %v1965_v11 = vmul.f32 %v785_v47, %v785_v47  ;;  %v1968_v10 = vmul.f32 %v783_v18, %v1921_v49  ;;  %v1971_v2 = vmul.f32 %v785_v47, %v1919_v0 }
 0x14b   :  { %v890_v38 = vpop.permute.xlu1 %889  ;;  %v888_v28 = vpop.permute.xlu0 %887  ;;  %v1977_v24 = vmul.f32 %v784_v15, %v784_v15  ;;  %v1980_v4 = vmul.f32 %v784_v15, %v1923_v26  ;;  %v786_v26 = vmul.f32 0.2920817, %v1559_v41  ;;  %v787_v29 = vmul.f32 0.2920817, %v1555_v40 }
 0x14c   :  { %v1984_v27 = vadd.f32 %v1963_v57, %v1957_v61  ;;  %v1988_v49 = vadd.f32 %v1965_v11, %v1961_v48  ;;  %v893_v6 = vadd.f32 %v890_v38, %v884_v21  ;;  %v805_v55 = vmul.f32 0.23388076, %v802_v32 }
 0x14d   :  { %v1992_v0 = vadd.f32 %v1977_v24, %v1975_v1  ;;  %v807_v59 = vadd.f32 %v804_v37, %v786_v26  ;;  %v876_v41 = vmul.f32 0.2920817, %v1618_v3  ;;  %v894_v56 = vmul.f32 0.23388076, %v891_v8 }
 0x14e   :  { %v892_v63 = vadd.f32 %v888_v28, %v882_v16  ;;  %v878_v39 = vmul.f32 0.2920817, %v1654_v62  ;;  %v896_v5 = vmul.f32 0.23388076, %v893_v6  ;;  %v809_v52 = vadd.f32 %v806_v20, %v788_v51 }
 0x14f   :  { %v813_v7 = vpop.permute.xlu1 %812  ;;  %v808_v44 = vadd.f32 %v805_v55, %v787_v29  ;;  %v897_v17 = vadd.f32 %v894_v56, %v876_v41  ;;  %v2004_v40 = vmul.f32 0.2920817, %v1609_v50 }
 0x150   :  { %v811_v42 = vpop.permute.xlu0 %810  ;;  %v2006_v12 = vmul.f32 0.23388076, %v892_v63  ;;  %v899_v16 = vadd.f32 %v896_v5, %v878_v39 }
 0x153   :  { %v817_v14 = vpop.permute.xlu1 %816 }
 0x154   :  { %v822_v43 = vadd.f32 %v817_v14, %v811_v42  ;;  %v815_v25 = vpop.permute.xlu0 %814 }
 0x156   :  { %v825_v33 = vmul.f32 0.120078385, %v822_v43 }
 0x157   :  { %v821_v13 = vpop.permute.xlu1 %820 }
 0x158   :  { %v824_v54 = vadd.f32 %v821_v13, %v815_v25  ;;  %v819_v35 = vpop.permute.xlu0 %818  ;;  %v828_v22 = vadd.f32 %v825_v33, %v807_v59 }
 0x159   :  { %v823_v36 = vadd.f32 %v819_v35, %v813_v7 }
 0x15a   :  { %v827_v31 = vmul.f32 0.120078385, %v824_v54  ;;  %v831_v45 = vmul.f32 0.2920817, %v828_v22  ;;  %v834_v62 = vrot.slane %v828_v22, 7  ;;  %v840_v18 = vrot.slane %v828_v22, 1 }
 0x15b   :  { %v826_v19 = vmul.f32 0.120078385, %v823_v36  ;;  %v903_v23 = vpop.permute.xlu1 %902  ;;  %v855_v47 = vrot.slane %v828_v22, 6  ;;  %v861_v15 = vrot.slane %v828_v22, 2 }
 0x15c   :  { %v901_v3 = vpop.permute.xlu0 %900  ;;  %v830_v21 = vadd.f32 %v827_v31, %v809_v52 }
 0x15d   :  { %v829_v30 = vadd.f32 %v826_v19, %v808_v44 }
 0x15e   :  { %v833_v38 = vmul.f32 0.2920817, %v830_v21  ;;  %v836_v28 = vrot.slane %v830_v21, 7  ;;  %v842_v58 = vrot.slane %v830_v21, 1  ;;  %v857_v7 = vrot.slane %v830_v21, 6 }
 0x15f   :  { %v907_v42 = vpop.permute.xlu1 %906  ;;  %v863_v26 = vrot.slane %v830_v21, 2  ;;  %v832_v37 = vmul.f32 0.2920817, %v829_v30  ;;  %v835_v50 = vrot.slane %v829_v30, 7  ;;  %v841_v60 = vrot.slane %v829_v30, 1 }
 0x160   :  { %v905_v32 = vpop.permute.xlu0 %904  ;;  %v839_v14 = vsel %vm108_vm0, %v836_v28, %v834_v62  ;;  %v845_v8 = vsel %vm115_vm1, %v842_v58, %v840_v18  ;;  %v860_v43 = vsel %vm131_vm2, %v857_v7, %v855_v47  ;;  %v856_v25 = vrot.slane %v829_v30, 6 }
 0x161   :  { %v866_v6 = vsel %vm138_vm3, %v863_v26, %v861_v15  ;;  %v837_v51 = vsel %vm108_vm0, %v835_v50, %v836_v28  ;;  %v838_v33 = vsel %vm108_vm0, %v834_v62, %v835_v50  ;;  %v843_v59 = vsel %vm115_vm1, %v841_v60, %v842_v58 }
 0x162   :  { %v844_v20 = vsel %vm115_vm1, %v840_v18, %v841_v60  ;;  %v847_v29 = vadd.f32 %v843_v59, %v838_v33  ;;  %v848_v55 = vadd.f32 %v845_v8, %v837_v51  ;;  %v858_v13 = vsel %vm131_vm2, %v856_v25, %v857_v7 }
 0x163   :  { %v911_v41 = vpop.permute.xlu1 %910  ;;  %v846_v56 = vadd.f32 %v844_v20, %v839_v14  ;;  %v859_v63 = vsel %vm131_vm2, %v855_v47, %v856_v25  ;;  %v862_v54 = vrot.slane %v829_v30, 2  ;;  %v869_v35 = vadd.f32 %v866_v6, %v858_v13 }
 0x164   :  { %v909_v39 = vpop.permute.xlu0 %908  ;;  %v850_v5 = vmul.f32 0.23388076, %v847_v29  ;;  %v851_v22 = vmul.f32 0.23388076, %v848_v55  ;;  %v912_v36 = vadd.f32 %v907_v42, %v901_v3  ;;  %v914_v52 = vadd.f32 %v911_v41, %v905_v32 }
 0x165   :  { %v849_v44 = vmul.f32 0.23388076, %v846_v56  ;;  %v864_v31 = vsel %vm138_vm3, %v862_v54, %v863_v26  ;;  %v865_v19 = vsel %vm138_vm3, %v861_v15, %v862_v54  ;;  %v872_v21 = vmul.f32 0.120078385, %v869_v35 }
 0x166   :  { %v853_v62 = vadd.f32 %v850_v5, %v832_v37  ;;  %v854_v18 = vadd.f32 %v851_v22, %v833_v38  ;;  %v867_v28 = vadd.f32 %v865_v19, %v860_v43  ;;  %v868_v58 = vadd.f32 %v864_v31, %v859_v63 }
 0x167   :  { %v2032_v47 = vpop.permute.xlu1 %971  ;;  %v852_v30 = vadd.f32 %v849_v44, %v831_v45  ;;  %v915_v7 = vmul.f32 0.120078385, %v912_v36  ;;  %v917_v50 = vmul.f32 0.120078385, %v914_v52  ;;  %v913_v60 = vadd.f32 %v909_v39, %v903_v23 }
 0x168   :  { %v970_v3 = vpop.permute.xlu0 %969  ;;  %v870_v42 = vmul.f32 0.120078385, %v867_v28  ;;  %v871_v32 = vmul.f32 0.120078385, %v868_v58  ;;  %v2034_v14 = vadd.f32 %v872_v21, %v854_v18  ;;  %v898_v45 = vadd.f32 %v2006_v12, %v2004_v40 }
 0x169   :  { %v918_v26 = vadd.f32 %v915_v7, %v897_v17  ;;  %v920_v8 = vadd.f32 %v917_v50, %v899_v16  ;;  %v916_v37 = vmul.f32 0.120078385, %v913_v60 }
 0x16a   :  { %v2036_v25 = vadd.f32 %v870_v42, %v852_v30  ;;  %v2038_v15 = vadd.f32 %v871_v32, %v853_v62  ;;  %v1067_v38 = vsub.f32 %v2034_v14, %v1961_v48 }
 0x16b   :  { %v976_v43 = vpop.permute.xlu1 %975  ;;  %v924_v23 = vrot.slane %v918_v26, 7  ;;  %v930_v6 = vrot.slane %v918_v26, 1  ;;  %v945_v16 = vrot.slane %v918_v26, 6  ;;  %v951_v59 = vrot.slane %v918_v26, 2 }
 0x16c   :  { %v974_v51 = vpop.permute.xlu0 %973  ;;  %v1065_v33 = vsub.f32 %v2036_v25, %v1957_v61  ;;  %v1066_v17 = vsub.f32 %v2038_v15, %v1975_v1  ;;  %v926_v20 = vrot.slane %v920_v8, 7  ;;  %v932_v29 = vrot.slane %v920_v8, 1 }
 0x16d   :  { %v947_v55 = vrot.slane %v920_v8, 6  ;;  %v953_v13 = vrot.slane %v920_v8, 2  ;;  %v921_v41 = vmul.f32 0.2920817, %v918_v26  ;;  %v919_v56 = vadd.f32 %v916_v37, %v898_v45 }
 0x16e   :  { %v929_v40 = vsel %vm108_vm0, %v926_v20, %v924_v23  ;;  %v935_v12 = vsel %vm115_vm1, %v932_v29, %v930_v6  ;;  %v923_v5 = vmul.f32 0.2920817, %v920_v8  ;;  %v981_v19 = vadd.f32 %v976_v43, %v970_v3 }
 0x16f   :  { %v980_v63 = vpop.permute.xlu1 %979  ;;  %v950_v54 = vsel %vm131_vm2, %v947_v55, %v945_v16  ;;  %v956_v35 = vsel %vm138_vm3, %v953_v13, %v951_v59  ;;  %v925_v22 = vrot.slane %v919_v56, 7  ;;  %v931_v36 = vrot.slane %v919_v56, 1 }
 0x170   :  { %v978_v39 = vpop.permute.xlu0 %977  ;;  %v946_v52 = vrot.slane %v919_v56, 6  ;;  %v922_v44 = vmul.f32 0.2920817, %v919_v56  ;;  %v952_v31 = vrot.slane %v919_v56, 2  ;;  %v983_v21 = vadd.f32 %v980_v63, %v974_v51 }
 0x171   :  { %v927_v62 = vsel %vm108_vm0, %v925_v22, %v926_v20  ;;  %v928_v18 = vsel %vm108_vm0, %v924_v23, %v925_v22  ;;  %v933_v28 = vsel %vm115_vm1, %v931_v36, %v932_v29  ;;  %v934_v58 = vsel %vm115_vm1, %v930_v6, %v931_v36 }
 0x172   :  { %v936_v7 = vadd.f32 %v934_v58, %v929_v40  ;;  %v937_v50 = vadd.f32 %v933_v28, %v928_v18  ;;  %v938_v60 = vadd.f32 %v935_v12, %v927_v62  ;;  %v948_v3 = vsel %vm131_vm2, %v946_v52, %v947_v55 }
 0x173   :  { %v993_v30 = vpop.permute.xlu1 %992  ;;  %v949_v32 = vsel %vm131_vm2, %v945_v16, %v946_v52  ;;  %v954_v26 = vsel %vm138_vm3, %v952_v31, %v953_v13  ;;  %v955_v8 = vsel %vm138_vm3, %v951_v59, %v952_v31  ;;  %v959_v37 = vadd.f32 %v956_v35, %v948_v3 }
 0x174   :  { %v991_v42 = vpop.permute.xlu0 %990  ;;  %v939_v43 = vmul.f32 0.23388076, %v936_v7  ;;  %v940_v45 = vmul.f32 0.23388076, %v937_v50  ;;  %v941_v23 = vmul.f32 0.23388076, %v938_v60  ;;  %v957_v6 = vadd.f32 %v955_v8, %v950_v54 }
 0x175   :  { %v958_v51 = vadd.f32 %v954_v26, %v949_v32  ;;  %v962_v20 = vmul.f32 0.120078385, %v959_v37  ;;  %v966_v29 = vmul.f32 0.2920817, %v1744_v9  ;;  %v984_v55 = vmul.f32 0.23388076, %v981_v19 }
 0x176   :  { %v942_v63 = vadd.f32 %v939_v43, %v921_v41  ;;  %v943_v40 = vadd.f32 %v940_v45, %v922_v44  ;;  %v944_v16 = vadd.f32 %v941_v23, %v923_v5  ;;  %v960_v12 = vmul.f32 0.120078385, %v957_v6 }
 0x177   :  { %v997_v56 = vpop.permute.xlu1 %996  ;;  %v961_v13 = vmul.f32 0.120078385, %v958_v51  ;;  %v968_v36 = vmul.f32 0.2920817, %v1748_v34  ;;  %v982_v59 = vadd.f32 %v978_v39, %v2032_v47  ;;  %v986_v54 = vmul.f32 0.23388076, %v983_v21 }
 0x178   :  { %v995_v22 = vpop.permute.xlu0 %994  ;;  %v1002_v35 = vadd.f32 %v997_v56, %v991_v42  ;;  %v963_v52 = vadd.f32 %v960_v12, %v942_v63  ;;  %v965_v31 = vadd.f32 %v962_v20, %v944_v16  ;;  %v967_v62 = vmul.f32 0.2920817, %v1738_v53 }
 0x179   :  { %v964_v18 = vadd.f32 %v961_v13, %v943_v40  ;;  %v987_v9 = vadd.f32 %v984_v55, %v966_v29  ;;  %v1092_v41 = vadd.f32 0.0001, %v1984_v27  ;;  %v1093_v5 = vadd.f32 0.0001, %v1992_v0 }
 0x17a   :  { %v1005_v19 = vmul.f32 0.120078385, %v1002_v35  ;;  %v1068_v44 = vsub.f32 %v963_v52, %v1963_v57  ;;  %v1070_v34 = vsub.f32 %v965_v31, %v1965_v11  ;;  %v985_v7 = vmul.f32 0.23388076, %v982_v59 }
 0x17b   :  { %v1001_v28 = vpop.permute.xlu1 %1000  ;;  %v1069_v39 = vsub.f32 %v964_v18, %v1977_v24  ;;  %v989_v0 = vadd.f32 %v986_v54, %v968_v36  ;;  %v1094_v24 = vadd.f32 0.0001, %v1988_v49 }
 0x17c   :  { %v1004_v58 = vadd.f32 %v1001_v28, %v995_v22  ;;  %v999_v47 = vpop.permute.xlu0 %998  ;;  %v1008_v21 = vadd.f32 %v1005_v19, %v987_v9  ;;  %v1095_v53 = vadd.f32 %v1068_v44, %v1065_v33  ;;  %v1097_v27 = vadd.f32 %v1070_v34, %v1067_v38 }
 0x17d   :  { %v1003_v50 = vadd.f32 %v999_v47, %v993_v30  ;;  %v1096_v57 = vadd.f32 %v1069_v39, %v1066_v17  ;;  %v988_v25 = vadd.f32 %v985_v7, %v967_v62 }
 0x17e   :  { %v1007_v60 = vmul.f32 0.120078385, %v1004_v58  ;;  %v1011_v11 = vmul.f32 0.2920817, %v1008_v21  ;;  %v1014_v3 = vrot.slane %v1008_v21, 7  ;;  %v1020_v42 = vrot.slane %v1008_v21, 1 }
 0x17f   :  { %v1035_v30 = vrot.slane %v1008_v21, 6  ;;  %v1006_v26 = vmul.f32 0.120078385, %v1003_v50  ;;  %v1099_v61 = vadd.f32 0.0009, %v1096_v57  ;;  %v1041_v48 = vrot.slane %v1008_v21, 2 }
 0x180   :  { %v1010_v32 = vadd.f32 %v1007_v60, %v989_v0  ;;  %v1098_v33 = vadd.f32 0.0009, %v1095_v53  ;;  %v1100_v8 = vadd.f32 0.0009, %v1097_v27  ;;  %v1074_v53 = vmul.f32 2.0, %v1968_v10 }
 0x181   :  { %v1009_v45 = vadd.f32 %v1006_v26, %v988_v25  ;;  %v2091_v15 = vmul.f32 %v1099_v61, %v1093_v5  ;;  %v1076_v60 = vmul.f32 2.0, %v1971_v2  ;;  %v1075_v57 = vmul.f32 2.0, %v1980_v4 }
 0x182   :  { %v1016_v14 = vrot.slane %v1010_v32, 7  ;;  %v1022_v38 = vrot.slane %v1010_v32, 1  ;;  %v1037_v37 = vrot.slane %v1010_v32, 6  ;;  %v1043_v43 = vrot.slane %v1010_v32, 2 }
 0x183   :  { %v1101_v1 = vmul.f32 %v1098_v33, %v1092_v41  ;;  %v2099_v6 = vmul.f32 %v1100_v8, %v1094_v24  ;;  %v1013_v51 = vmul.f32 0.2920817, %v1010_v32  ;;  %v1015_v29 = vrot.slane %v1009_v45, 7 }
 0x184   :  { %v1019_v49 = vsel %vm108_vm0, %v1016_v14, %v1014_v3  ;;  %v1025_v17 = vsel %vm115_vm1, %v1022_v38, %v1020_v42  ;;  %v1040_v23 = vsel %vm131_vm2, %v1037_v37, %v1035_v30  ;;  %v1046_v20 = vsel %vm138_vm3, %v1043_v43, %v1041_v48 }
 0x185   :  { %v1021_v55 = vrot.slane %v1009_v45, 1  ;;  %v1012_v56 = vmul.f32 0.2920817, %v1009_v45  ;;  %v1036_v63 = vrot.slane %v1009_v45, 6  ;;  %v1042_v40 = vrot.slane %v1009_v45, 2 }
 0x186   :  { %1168 = vrcp.f32 %v1101_v1  ;;  %v1017_v16 = vsel %vm108_vm0, %v1015_v29, %v1016_v14  ;;  %v1018_v12 = vsel %vm108_vm0, %v1014_v3, %v1015_v29  ;;  %v1077_v32 = vadd.f32 0.0001, %v1074_v53 }
 0x187   :  { %v1023_v22 = vsel %vm115_vm1, %v1021_v55, %v1022_v38  ;;  %v1024_v13 = vsel %vm115_vm1, %v1020_v42, %v1021_v55  ;;  %v1028_v35 = vadd.f32 %v1025_v17, %v1017_v16  ;;  %v1038_v52 = vsel %vm131_vm2, %v1036_v63, %v1037_v37 }
 0x188   :  { %v1026_v36 = vadd.f32 %v1024_v13, %v1019_v49  ;;  %v1027_v59 = vadd.f32 %v1023_v22, %v1018_v12  ;;  %v1039_v31 = vsel %vm131_vm2, %v1035_v30, %v1036_v63  ;;  %v1044_v54 = vsel %vm138_vm3, %v1042_v40, %v1043_v43 }
 0x189   :  { %v1045_v62 = vsel %vm138_vm3, %v1041_v48, %v1042_v40  ;;  %v1049_v18 = vadd.f32 %v1046_v20, %v1038_v52  ;;  %v1031_v28 = vmul.f32 0.23388076, %v1028_v35  ;;  %v1048_v5 = vadd.f32 %v1044_v54, %v1039_v31 }
 0x18a   :  { %v1029_v9 = vmul.f32 0.23388076, %v1026_v36  ;;  %v1030_v19 = vmul.f32 0.23388076, %v1027_v59  ;;  %v1047_v41 = vadd.f32 %v1045_v62, %v1040_v23  ;;  %1170 = vrcp.f32 %v2091_v15 }
 0x18b   :  { %v1052_v44 = vmul.f32 0.120078385, %v1049_v18  ;;  %v1034_v47 = vadd.f32 %v1031_v28, %v1013_v51  ;;  %v1051_v7 = vmul.f32 0.120078385, %v1048_v5  ;;  %1172 = vrcp.f32 %v2099_v6 }
 0x18c   :  { %v1032_v34 = vadd.f32 %v1029_v9, %v1011_v11  ;;  %v1033_v58 = vadd.f32 %v1030_v19, %v1012_v56  ;;  %v1050_v39 = vmul.f32 0.120078385, %v1047_v41  ;;  %v1079_v26 = vadd.f32 0.0001, %v1076_v60 }
 0x18d   :  { %v1055_v50 = vadd.f32 %v1052_v44, %v1034_v47  ;;  %v1078_v48 = vadd.f32 0.0001, %v1075_v57 }
 0x18e   :  { %v1053_v21 = vadd.f32 %v1050_v39, %v1032_v34  ;;  %v1054_v46 = vadd.f32 %v1051_v7, %v1033_v58 }
 0x18f   :  { %v1073_v0 = vsub.f32 %v1055_v50, %v1971_v2 }
 0x190   :  { %v1071_v27 = vsub.f32 %v1053_v21, %v1968_v10  ;;  %v1072_v11 = vsub.f32 %v1054_v46, %v1980_v4 }
 0x191   :  { %v1082_v24 = vmul.f32 2.0, %v1073_v0 }
 0x192   :  { %v1080_v3 = vmul.f32 2.0, %v1071_v27  ;;  %v1081_v30 = vmul.f32 2.0, %v1072_v11 }
 0x193   :  { %v1169_v42 = vpop.eup %1168  ;;  %v1085_v25 = vadd.f32 0.0009, %v1082_v24 }
 0x194   :  { %v1083_v61 = vadd.f32 0.0009, %v1080_v3  ;;  %v1107_v33 = vmul.f32 %v1169_v42, %v1101_v1  ;;  %v1084_v8 = vadd.f32 0.0009, %v1081_v30 }
 0x195   :  { %v1088_v14 = vmul.f32 %v1085_v25, %v1079_v26 }
 0x196   :  { %v1086_v10 = vmul.f32 %v1083_v61, %v1077_v32  ;;  %v1110_v38 = vsub.f32 2.0, %v1107_v33  ;;  %v1087_v37 = vmul.f32 %v1084_v8, %v1078_v48 }
 0x197   :  { %v1171_v2 = vpop.eup %1170 }
 0x198   :  { %v1113_v43 = vmul.f32 %v1169_v42, %v1110_v38  ;;  %v1108_v45 = vmul.f32 %v1171_v2, %v2091_v15  ;;  %v1173_v4 = vpop.eup %1172 }
 0x199   :  { %v1109_v17 = vmul.f32 %v1173_v4, %v2099_v6 }
 0x19a   :  { %v1116_v49 = vmul.f32 %v1113_v43, %v1086_v10  ;;  %v1111_v23 = vsub.f32 2.0, %v1108_v45 }
 0x19b   :  { %v1112_v20 = vsub.f32 2.0, %v1109_v17 }
 0x19c   :  { %v1119_v51 = vsub.f32 1.0, %v1116_v49  ;;  %v1114_v29 = vmul.f32 %v1171_v2, %v1111_v23 }
 0x19d   :  { %v1115_v1 = vmul.f32 %v1173_v4, %v1112_v20 }
 0x19e   :  { %v1122_v55 = vmax.f32 %v1119_v51, 0.0  ;;  %v1117_v56 = vmul.f32 %v1114_v29, %v1087_v37 }
 0x19f   :  { %v1118_v40 = vmul.f32 %v1115_v1, %v1088_v14 }
 0x1a0   :  { %v1125_v63 = vmin.f32 %v1122_v55, 1.0  ;;  %v1120_v16 = vsub.f32 1.0, %v1117_v56 }
 0x1a1   :  { %v1121_v22 = vsub.f32 1.0, %v1118_v40 }
 0x1a2   :  { %v1128_v12 = vmul.f32 0.5, %v1125_v63  ;;  %v1123_v13 = vmax.f32 %v1120_v16, 0.0 }
 0x1a3   :  { %v1124_v36 = vmax.f32 %v1121_v22, 0.0 }
 0x1a4   :  { %1132 = vst [vmem:[#allocation7 + $0x18] sm:$0xff] %v1128_v12  ;;  %v1126_v15 = vmin.f32 %v1123_v13, 1.0 }
 0x1a5   :  { %v1127_v59 = vmin.f32 %v1124_v36, 1.0 }
 0x1a6   :  { %v1129_v6 = vmul.f32 0.5, %v1126_v15 }
 0x1a7   :  { %v1130_v35 = vmul.f32 0.5, %v1127_v59 }
 0x1a8   :  { %1133 = vst [vmem:[#allocation7 + $0x20] sm:$0xff] %v1129_v6 }
 0x1a9   :  { %1134 = vst [vmem:[#allocation7 + $0x28] sm:$0xff] %v1130_v35 }
 0x1aa   :  { %1231 = shalt.err (!%p1228_p0)
}
 0x1ab   :  { %1146 = dma.vmem_to_hbm [thread:$0]  %s1141_s24, 768, %s2137_s2, [#allocation4], %s1247_s12, %s1247_s12, %s1248_s13  }
 0x1ac   :  { %1244 = dma.done.wait [#allocation4], 768  }
 0x1ad   :  { %1245 = vsyncadd [#allocation4], 4294966528 }
 0x1ae   :  { %1150 = vsyncpa [#allocation3], 1 }
 0x1af   :  { %1151 = vsyncpa [#allocation6], 1 }
 0x1b0   :  { %1152 = vsyncpa [#allocation4], 1 }

</bundles_post_ra>
